<compile_context>
chip_gen: v6e
topology: v6e:2x2x1
jax: 0.10.0
libtpu: 0.0.40
codegen_flags: <defaults>
</compile_context>

<pallas_src>
import jax
import jax.numpy as jnp
from jax.experimental import pallas as pl
from jax.experimental.pallas import tpu as pltpu

LANE = 128
SUBLANE = 8
VMEM_LIMIT = 48 * 1024 * 1024  # fits every generation's physical VMEM


def _round_up(x, m):
    return (x + m - 1) // m * m


def _pad2d(x, rows, cols):
    r, c = x.shape
    return jnp.pad(x, ((0, rows - r), (0, cols - c)))


# ---------------------------------------------------------------------------
# One GIN layer:  h_out = relu(relu(((A+I) @ x) @ W1 + b1) @ W2 + b2)
# (eps = 0 folded into A+I; the outer F.relu in the module is a no-op after
#  the final ReLU.)
# ---------------------------------------------------------------------------
def gin_layer(a, x, w1, b1, w2, b2, *, tile_m, tile_k):
    n = a.shape[0]
    f = x.shape[1]
    h = w1.shape[1]
    assert n % tile_m == 0 and n % tile_k == 0
    grid = (n // tile_m, n // tile_k)
    n_steps = grid[0] * grid[1]
    a_bufs = 3 if n_steps >= 3 else 2  # deeper A pipelining once grid is real

    def kernel(a_ref, x_ref, w1_ref, b1_ref, w2_ref, b2_ref, out_ref, acc_ref):
        k = pl.program_id(1)

        @pl.when(k == 0)
        def _():
            # self term already folded into A (+I), so start from zero
            acc_ref[...] = jnp.zeros_like(acc_ref)

        row0 = pl.multiple_of(k * tile_k, tile_k)
        acc_ref[...] += jnp.dot(a_ref[...], x_ref[pl.ds(row0, tile_k), :],
                                preferred_element_type=jnp.float32)

        @pl.when(k == pl.num_programs(1) - 1)
        def _():
            hb = acc_ref[...].astype(jnp.bfloat16)
            t = jnp.maximum(jnp.dot(hb, w1_ref[...],
                                    preferred_element_type=jnp.float32)
                            + b1_ref[...], 0.0)
            t = jnp.maximum(jnp.dot(t.astype(jnp.bfloat16), w2_ref[...],
                                    preferred_element_type=jnp.float32)
                            + b2_ref[...], 0.0)
            out_ref[...] = t.astype(out_ref.dtype)

    cost = pl.CostEstimate(
        flops=2 * n * n * f + 2 * n * (f * h + h * h),
        transcendentals=0,
        bytes_accessed=(a.size + x.size + w1.size + w2.size + n * h) * 2
        + (b1.size + b2.size) * 4)

    return pl.pallas_call(
        kernel,
        out_shape=jax.ShapeDtypeStruct((n, h), jnp.bfloat16),
        grid=grid,
        in_specs=[
            # A+I block (the only big streamed input); extra buffering hides DMA
            pl.BlockSpec((tile_m, tile_k), lambda i, k: (i, k),
                         pipeline_mode=pl.Buffered(a_bufs)),
            # x / h fully VMEM-resident (constant index_map => DMA'd once)
            pl.BlockSpec((n, f), lambda i, k: (0, 0)),
            pl.BlockSpec((f, h), lambda i, k: (0, 0)),   # W1 (resident)
            pl.BlockSpec((1, h), lambda i, k: (0, 0)),   # b1
            pl.BlockSpec((h, h), lambda i, k: (0, 0)),   # W2
            pl.BlockSpec((1, h), lambda i, k: (0, 0)),   # b2
        ],
        out_specs=pl.BlockSpec((tile_m, h), lambda i, k: (i, 0)),
        scratch_shapes=[pltpu.VMEM((tile_m, f), jnp.float32)],
        compiler_params=pltpu.CompilerParams(
            dimension_semantics=("parallel", "arbitrary"),
            vmem_limit_bytes=VMEM_LIMIT),
        cost_estimate=cost,
    )(a, x, w1, b1, w2, b2)


# ---------------------------------------------------------------------------
# Readout (global_add_pool) + fc1:  out = (P @ h2) @ Wfc + bfc
# ---------------------------------------------------------------------------
def pool_fc_kernel(p_ref, h_ref, wfc_ref, bfc_ref, out_ref, acc_ref):
    k = pl.program_id(0)

    @pl.when(k == 0)
    def _():
        acc_ref[...] = jnp.zeros_like(acc_ref)

    acc_ref[...] += jnp.dot(p_ref[...], h_ref[...],
                            preferred_element_type=jnp.float32)

    @pl.when(k == pl.num_programs(0) - 1)
    def _():
        pooled = acc_ref[...].astype(jnp.bfloat16)
        out_ref[...] = (jnp.dot(pooled, wfc_ref[...],
                                preferred_element_type=jnp.float32)
                        + bfc_ref[...]).astype(out_ref.dtype)


def pool_fc(p, h2, wfc, bfc, *, tile_k):
    g, n = p.shape
    hd = wfc.shape[1]
    assert n % tile_k == 0
    cost = pl.CostEstimate(
        flops=2 * g * n * hd + 2 * g * hd * hd,
        transcendentals=0,
        bytes_accessed=(p.size + h2.size + wfc.size) * 2 + g * hd * 4)
    return pl.pallas_call(
        pool_fc_kernel,
        out_shape=jax.ShapeDtypeStruct((g, hd), jnp.float32),
        grid=(n // tile_k,),
        in_specs=[
            pl.BlockSpec((g, tile_k), lambda k: (0, k)),   # P block (streamed)
            pl.BlockSpec((tile_k, hd), lambda k: (k, 0)),  # h2 block (streamed)
            pl.BlockSpec((hd, hd), lambda k: (0, 0)),      # Wfc (resident)
            pl.BlockSpec((1, hd), lambda k: (0, 0)),       # bfc
        ],
        out_specs=pl.BlockSpec((g, hd), lambda k: (0, 0)),
        scratch_shapes=[pltpu.VMEM((g, hd), jnp.float32)],
        compiler_params=pltpu.CompilerParams(
            dimension_semantics=("arbitrary",),
            vmem_limit_bytes=VMEM_LIMIT),
        cost_estimate=cost,
    )(p, h2, wfc, bfc)


# ---------------------------------------------------------------------------
# Full forward (matches GIN.forward: conv1 -> relu -> conv2 -> relu ->
# global_add_pool -> fc1)
# ---------------------------------------------------------------------------
def gin_forward(x, edge_index, batch, params, num_graphs, *,
                tile_m=256, tile_k=512):
    """x: (N, F) f32, edge_index: (2, E) int32 (row 0 = src j, row 1 = dst i),
    batch: (N,) int32 graph id per node."""
    assert tile_k % tile_m == 0, "tile_m must divide tile_k"
    n, f = x.shape
    hidden = params["w2a"].shape[1]

    n_pad = _round_up(max(n, tile_k), tile_k)
    f_pad = _round_up(f, LANE)
    h_pad = _round_up(hidden, LANE)
    g_pad = _round_up(max(num_graphs, SUBLANE), SUBLANE)

    # dense adjacency with self term folded in, built directly in bf16:
    #   A[i, j] = #edges j -> i  (+1 on the diagonal for the (1+eps)*x_i term,
    #   eps = 0).  Small integer counts (<=256) are exact in bf16.  Padded
    #   rows/cols stay zero off-diagonal, so padded nodes never contaminate
    #   real nodes.
    diag = jnp.arange(n_pad, dtype=jnp.int32)
    a = (jnp.zeros((n_pad, n_pad), jnp.bfloat16)
         .at[edge_index[1], edge_index[0]].add(1.0)
         .at[diag, diag].add(1.0))

    x_p = _pad2d(x, n_pad, f_pad).astype(jnp.bfloat16)

    # pooling matrix: P[g, node] = 1 iff batch[node] == g (0 for padded nodes)
    p = (batch[None, :] == jnp.arange(num_graphs, dtype=batch.dtype)[:, None]
         ).astype(jnp.bfloat16)
    p = _pad2d(p, g_pad, n_pad)

    def pad_w(w):
        return _pad2d(w, _round_up(w.shape[0], LANE),
                      _round_up(w.shape[1], LANE)).astype(jnp.bfloat16)

    def pad_b(b):
        return _pad2d(b, 1, _round_up(b.shape[1], LANE)).astype(jnp.float32)

    w1a, b1a = pad_w(params["w1a"]), pad_b(params["b1a"])
    w2a, b2a = pad_w(params["w2a"]), pad_b(params["b2a"])
    w1b, b1b = pad_w(params["w1b"]), pad_b(params["b1b"])
    w2b, b2b = pad_w(params["w2b"]), pad_b(params["b2b"])
    wfc, bfc = pad_w(params["wfc"]), pad_b(params["bfc"])

    h1 = gin_layer(a, x_p, w1a, b1a, w2a, b2a, tile_m=tile_m, tile_k=tile_k)
    # outer F.relu(x) is a no-op: the MLP already ends in ReLU
    h2 = gin_layer(a, h1, w1b, b1b, w2b, b2b, tile_m=tile_m, tile_k=tile_k)

    # larger reduction tile for the (tiny-output) pooling matmul
    tile_pk = tile_k
    for mult in (4, 3, 2):
        if n_pad % (tile_k * mult) == 0:
            tile_pk = tile_k * mult
            break
    out = pool_fc(p, h2, wfc, bfc, tile_k=tile_pk)
    return out[:num_graphs, :hidden]


def init_params(key, num_node_features, hidden_dim):
    # deterministic synthetic weights; Linear weight stored pre-transposed (in, out)
    ks = jax.random.split(key, 10)

    def lin(k, fan_in, fan_out):
        bound = 1.0 / jnp.sqrt(fan_in)
        kw, kb = jax.random.split(k)
        w = jax.random.uniform(kw, (fan_in, fan_out), jnp.float32, -bound, bound)
        b = jax.random.uniform(kb, (1, fan_out), jnp.float32, -bound, bound)
        return w, b

    w1a, b1a = lin(ks[0], num_node_features, hidden_dim)
    w2a, b2a = lin(ks[1], hidden_dim, hidden_dim)
    w1b, b1b = lin(ks[2], hidden_dim, hidden_dim)
    w2b, b2b = lin(ks[3], hidden_dim, hidden_dim)
    wfc, bfc = lin(ks[4], hidden_dim, hidden_dim)
    return dict(w1a=w1a, b1a=b1a, w2a=w2a, b2a=b2a,
                w1b=w1b, b1b=b1b, w2b=w2b, b2b=b2b,
                wfc=wfc, bfc=bfc)


if __name__ == "__main__":
    num_node_features = 8
    hidden_dim = 32
    num_nodes = 16
    num_edges = 40
    num_graphs = 2

    key = jax.random.PRNGKey(0)
    k_x, k_e, k_p = jax.random.split(key, 3)

    x = jax.random.normal(k_x, (num_nodes, num_node_features), jnp.float32)
    edge_index = jax.random.randint(k_e, (2, num_edges), 0, num_nodes, jnp.int32)
    # first half of nodes in graph 0, second half in graph 1
    batch = (jnp.arange(num_nodes, dtype=jnp.int32) >= num_nodes // 2).astype(jnp.int32)

    params = init_params(k_p, num_node_features, hidden_dim)

    out = gin_forward(x, edge_index, batch, params, num_graphs)
    out = jax.block_until_ready(out)

    # pure-JAX reference emulating the kernel's bf16-input / f32-accumulate math
    def ref_forward():
        bf = jnp.bfloat16
        f32 = jnp.float32

        def mm(a_, b_):
            return jnp.dot(a_.astype(bf), b_.astype(bf),
                           preferred_element_type=f32)

        a = jnp.zeros((num_nodes, num_nodes), f32
                      ).at[edge_index[1], edge_index[0]].add(1.0)
        h = x.astype(bf).astype(f32) + mm(a, x)
        h = jnp.maximum(mm(h, params["w1a"]) + params["b1a"], 0.0)
        h = jnp.maximum(mm(h, params["w2a"]) + params["b2a"], 0.0)
        h = h.astype(bf)  # layer output stored as bf16 in the kernel
        h2 = h.astype(f32) + mm(a, h)
        h2 = jnp.maximum(mm(h2, params["w1b"]) + params["b1b"], 0.0)
        h2 = jnp.maximum(mm(h2, params["w2b"]) + params["b2b"], 0.0)
        h2 = h2.astype(bf)
        p = (batch[None, :] == jnp.arange(num_graphs)[:, None]).astype(f32)
        pooled = mm(p, h2)
        return mm(pooled, params["wfc"]) + params["bfc"]

    ref = ref_forward()
    assert out.shape == (num_graphs, hidden_dim)
    assert jnp.allclose(out, ref, atol=2e-2, rtol=2e-2), (
        float(jnp.max(jnp.abs(out - ref))))
    print("KERNEL_OK")
</pallas_src>

<mosaic_0001>
module attributes {stable_mosaic.version = 11 : i64} {
  func.func @kernel(%arg0: i32, %arg1: i32, %arg2: memref<256x512xbf16, #tpu.memory_space<vmem>>, %arg3: memref<512x128xbf16, #tpu.memory_space<vmem>>, %arg4: memref<128x128xbf16, #tpu.memory_space<vmem>>, %arg5: memref<1x128xf32, #tpu.memory_space<vmem>>, %arg6: memref<128x128xbf16, #tpu.memory_space<vmem>>, %arg7: memref<1x128xf32, #tpu.memory_space<vmem>>, %arg8: memref<256x128xbf16, #tpu.memory_space<vmem>>, %arg9: memref<256x128xf32, #tpu.memory_space<vmem>>) attributes {dimension_semantics = [#tpu.dimension_semantics<parallel>, #tpu.dimension_semantics<arbitrary>], iteration_bounds = array<i64: 2, 1>, scalar_prefetch = 0 : i64, scratch_operands = 1 : i64, tpu.core_type = #tpu.core_type<tc>, window_params = [{pipeline_mode = #tpu.pipeline_mode<double_buffered>, transform_indices = @transform_0, window_bounds = array<i64: 256, 512>}, {pipeline_mode = #tpu.pipeline_mode<synchronous>, transform_indices = @transform_1, window_bounds = array<i64: 512, 128>}, {pipeline_mode = #tpu.pipeline_mode<synchronous>, transform_indices = @transform_2, window_bounds = array<i64: 128, 128>}, {pipeline_mode = #tpu.pipeline_mode<synchronous>, transform_indices = @transform_3, window_bounds = array<i64: 1, 128>}, {pipeline_mode = #tpu.pipeline_mode<synchronous>, transform_indices = @transform_4, window_bounds = array<i64: 128, 128>}, {pipeline_mode = #tpu.pipeline_mode<synchronous>, transform_indices = @transform_5, window_bounds = array<i64: 1, 128>}, {transform_indices = @transform_6, window_bounds = array<i64: 256, 128>}]} {
    %c0_i32 = arith.constant 0 : i32
    %0 = arith.cmpi eq, %arg1, %c0_i32 : i32
    %1 = arith.extui %0 : i1 to i32
    %c0_i32_0 = arith.constant 0 : i32
    %2 = arith.cmpi ne, %1, %c0_i32_0 : i32
    scf.if %2 {
      %cst_9 = arith.constant 0.000000e+00 : f32
      %15 = vector.broadcast %cst_9 : f32 to vector<256x128xf32>
      %c0_10 = arith.constant 0 : index
      %c0_11 = arith.constant 0 : index
      %16 = vector.load %arg9[%c0_10, %c0_11] : memref<256x128xf32, #tpu.memory_space<vmem>>, vector<256x128xf32>
      tpu.vector_store %arg9[%c0_10, %c0_11], %15 {strides = array<i32>} : memref<256x128xf32, #tpu.memory_space<vmem>>, vector<256x128xf32>,
    } else {
    }
    %c512_i32 = arith.constant 512 : i32
    %3 = arith.muli %arg1, %c512_i32 : i32
    %4 = tpu.assume_multiple %3, 512 : i32
    %c0 = arith.constant 0 : index
    %c0_1 = arith.constant 0 : index
    %5 = vector.load %arg9[%c0, %c0_1] : memref<256x128xf32, #tpu.memory_space<vmem>>, vector<256x128xf32>
    %c0_2 = arith.constant 0 : index
    %c0_3 = arith.constant 0 : index
    %6 = vector.load %arg2[%c0_2, %c0_3] : memref<256x512xbf16, #tpu.memory_space<vmem>>, vector<256x512xbf16>
    %7 = arith.index_cast %4 : i32 to index
    %c0_4 = arith.constant 0 : index
    %8 = vector.load %arg3[%7, %c0_4] : memref<512x128xbf16, #tpu.memory_space<vmem>>, vector<512x128xbf16>
    %cst = arith.constant dense<0.000000e+00> : vector<256x128xf32>
    %9 = tpu.matmul %6, %8, %cst {dimension_numbers = #tpu.dot_dimension_numbers<[1], [0], [0], [1], [0, 0, 1, 1], [], []>} : vector<256x512xbf16>, vector<512x128xbf16>, vector<256x128xf32> -> vector<256x128xf32>
    %10 = arith.addf %5, %9 : vector<256x128xf32>
    %c0_5 = arith.constant 0 : index
    %c0_6 = arith.constant 0 : index
    %11 = vector.load %arg9[%c0_5, %c0_6] : memref<256x128xf32, #tpu.memory_space<vmem>>, vector<256x128xf32>
    tpu.vector_store %arg9[%c0_5, %c0_6], %10 {strides = array<i32>} : memref<256x128xf32, #tpu.memory_space<vmem>>, vector<256x128xf32>,
    %c0_i32_7 = arith.constant 0 : i32
    %12 = arith.cmpi eq, %arg1, %c0_i32_7 : i32
    %13 = arith.extui %12 : i1 to i32
    %c0_i32_8 = arith.constant 0 : i32
    %14 = arith.cmpi ne, %13, %c0_i32_8 : i32
    scf.if %14 {
      %c0_9 = arith.constant 0 : index
      %c0_10 = arith.constant 0 : index
      %15 = vector.load %arg9[%c0_9, %c0_10] : memref<256x128xf32, #tpu.memory_space<vmem>>, vector<256x128xf32>
      %16 = arith.truncf %15 : vector<256x128xf32> to vector<256x128xbf16>
      %c0_11 = arith.constant 0 : index
      %c0_12 = arith.constant 0 : index
      %17 = vector.load %arg4[%c0_11, %c0_12] : memref<128x128xbf16, #tpu.memory_space<vmem>>, vector<128x128xbf16>
      %cst_13 = arith.constant dense<0.000000e+00> : vector<256x128xf32>
      %18 = tpu.matmul %16, %17, %cst_13 {dimension_numbers = #tpu.dot_dimension_numbers<[1], [0], [0], [1], [0, 0, 1, 1], [], []>} : vector<256x128xbf16>, vector<128x128xbf16>, vector<256x128xf32> -> vector<256x128xf32>
      %c0_14 = arith.constant 0 : index
      %c0_15 = arith.constant 0 : index
      %19 = vector.load %arg5[%c0_14, %c0_15] : memref<1x128xf32, #tpu.memory_space<vmem>>, vector<1x128xf32>
      %20 = vector.broadcast %19 : vector<1x128xf32> to vector<256x128xf32>
      %21 = arith.addf %18, %20 : vector<256x128xf32>
      %cst_16 = arith.constant 0.000000e+00 : f32
      %22 = vector.broadcast %cst_16 : f32 to vector<256x128xf32>
      %23 = arith.maximumf %21, %22 : vector<256x128xf32>
      %24 = arith.truncf %23 : vector<256x128xf32> to vector<256x128xbf16>
      %c0_17 = arith.constant 0 : index
      %c0_18 = arith.constant 0 : index
      %25 = vector.load %arg6[%c0_17, %c0_18] : memref<128x128xbf16, #tpu.memory_space<vmem>>, vector<128x128xbf16>
      %cst_19 = arith.constant dense<0.000000e+00> : vector<256x128xf32>
      %26 = tpu.matmul %24, %25, %cst_19 {dimension_numbers = #tpu.dot_dimension_numbers<[1], [0], [0], [1], [0, 0, 1, 1], [], []>} : vector<256x128xbf16>, vector<128x128xbf16>, vector<256x128xf32> -> vector<256x128xf32>
      %c0_20 = arith.constant 0 : index
      %c0_21 = arith.constant 0 : index
      %27 = vector.load %arg7[%c0_20, %c0_21] : memref<1x128xf32, #tpu.memory_space<vmem>>, vector<1x128xf32>
      %28 = vector.broadcast %27 : vector<1x128xf32> to vector<256x128xf32>
      %29 = arith.addf %26, %28 : vector<256x128xf32>
      %cst_22 = arith.constant 0.000000e+00 : f32
      %30 = vector.broadcast %cst_22 : f32 to vector<256x128xf32>
      %31 = arith.maximumf %29, %30 : vector<256x128xf32>
      %32 = arith.truncf %31 : vector<256x128xf32> to vector<256x128xbf16>
      %c0_23 = arith.constant 0 : index
      %c0_24 = arith.constant 0 : index
      %33 = vector.load %arg8[%c0_23, %c0_24] : memref<256x128xbf16, #tpu.memory_space<vmem>>, vector<256x128xbf16>
      tpu.vector_store %arg8[%c0_23, %c0_24], %32 {strides = array<i32>} : memref<256x128xbf16, #tpu.memory_space<vmem>>, vector<256x128xbf16>,
    } else {
    }
    return
  }
  func.func @transform_0(%arg0: i32, %arg1: i32) -> (i32, i32) {
    %c0_i32 = arith.constant 0 : i32
    return %arg0, %arg1 : i32, i32
  }
  func.func @transform_1(%arg0: i32, %arg1: i32) -> (i32, i32) {
    %c0_i32 = arith.constant 0 : i32
    %c0_i32_0 = arith.constant 0 : i32
    %c0_i32_1 = arith.constant 0 : i32
    return %c0_i32, %c0_i32_0 : i32, i32
  }
  func.func @transform_2(%arg0: i32, %arg1: i32) -> (i32, i32) {
    %c0_i32 = arith.constant 0 : i32
    %c0_i32_0 = arith.constant 0 : i32
    %c0_i32_1 = arith.constant 0 : i32
    return %c0_i32, %c0_i32_0 : i32, i32
  }
  func.func @transform_3(%arg0: i32, %arg1: i32) -> (i32, i32) {
    %c0_i32 = arith.constant 0 : i32
    %c0_i32_0 = arith.constant 0 : i32
    %c0_i32_1 = arith.constant 0 : i32
    return %c0_i32, %c0_i32_0 : i32, i32
  }
  func.func @transform_4(%arg0: i32, %arg1: i32) -> (i32, i32) {
    %c0_i32 = arith.constant 0 : i32
    %c0_i32_0 = arith.constant 0 : i32
    %c0_i32_1 = arith.constant 0 : i32
    return %c0_i32, %c0_i32_0 : i32, i32
  }
  func.func @transform_5(%arg0: i32, %arg1: i32) -> (i32, i32) {
    %c0_i32 = arith.constant 0 : i32
    %c0_i32_0 = arith.constant 0 : i32
    %c0_i32_1 = arith.constant 0 : i32
    return %c0_i32, %c0_i32_0 : i32, i32
  }
  func.func @transform_6(%arg0: i32, %arg1: i32) -> (i32, i32) {
    %c0_i32 = arith.constant 0 : i32
    %c0_i32_0 = arith.constant 0 : i32
    return %arg0, %c0_i32 : i32, i32
  }
}

</mosaic_0001>

<bundles_post_ra>
// kernel: tpu_custom_call.1
= control target key start
LH: loop header
LB: loop body
LE: loop exit
PB: predicated region body
PF: predicated region fallthrough
CT: control target
= control target key end

     0   :  { %s3829_s0 = inlined_call_operand.hbm [shape: bf16[512,512], index: 0, kind: input, shape index: {}]   ;;  %s3830_s1 = inlined_call_operand.hbm [shape: bf16[512,128], index: 1, kind: input, shape index: {}]   ;;  %s3831_s2 = inlined_call_operand.hbm [shape: bf16[128,128], index: 2, kind: input, shape index: {}]   ;;  %s3832_s3 = inlined_call_operand.vmem [shape: f32[1,128], index: 3, kind: input, shape index: {}]   ;;  %s3833_s4 = inlined_call_operand.hbm [shape: bf16[128,128], index: 4, kind: input, shape index: {}]   ;;  %s3834_s5 = inlined_call_operand.vmem [shape: f32[1,128], index: 5, kind: input, shape index: {}]   ;;  %s3835_s6 = inlined_call_operand.hbm [shape: bf16[512,128], index: 6, kind: output, shape index: {}]  }
   0x1   :  { %3840 = sst [smem:[#allocation16_spill]] %s3830_s1 }
   0x2   :  { %3841 = sst [smem:[#allocation17_spill]] %s3831_s2 }
   0x3   :  { %11 = vsyncpa [#allocation4], 0 }
   0x4   :  { %13 = vsyncpa [#allocation4 + $0x1], 0 }
   0x5   :  { %14 = vsyncpa [#allocation7], 0 }
   0x6   :  { %15 = vsyncpa [#allocation10], 0 }
   0x7   :  { %16 = vsyncpa [#allocation5], 0 }
   0x8   :  { %18 = vsyncpa [#allocation5 + $0x1], 0  ;;  %s3469_s21 = smov 0   ;;  %s3471_s22 = smov 0  }
   0x9   :  { %s3473_s23 = smov 0   ;;  %s3475_s24 = smov 0  }
   0xa   :  { %s3477_s25 = smov 0   ;;  %s3479_s26 = smov 0  }
   0xb LB: > { %s2318_s27 = sadd.s32 4294967295, %s3421_s26   ;;  %s2319_s28 = sadd.s32 4294967294, %s3421_s26   ;;  %s3421_s26 = sphi %s3479_s26, %s24_s26   ;;  %s3417_s25 = sphi %s3477_s25, %s3861_s25   ;;  %s3413_s24 = sphi %s3475_s24, %s3860_s24   ;;  %s3409_s23 = sphi %s3473_s23, %s3859_s23   ;;  %s3405_s22 = sphi %s3471_s22, %s3858_s22   ;;  %s3401_s21 = sphi %s3469_s21, %s3857_s21  }
   0xc   : > { %p58_p0 = scmp.ne.s32.totalorder %s3405_s22, %s3401_s21  ;;  %p3503_p1 = scmp.eq.s32.totalorder %s2318_s27, 0 }
   0xd   : > { %p3507_p2 = scmp.eq.s32.totalorder %s2318_s27, 1  ;;  %p193_p3 = scmp.eq.s32.totalorder %s2319_s28, 1 }
   0xe   : > { %s3842_s29 = scalar_select %p3503_p1, 1, 0 }
   0xf   : > { %p3513_p4 = por %p3503_p1, %p58_p0  ;;  %p2320_p5 = scmp.ge.s32.totalorder %s3421_s26, 1 }
  0x10   : > { %p3518_p6 = por %p193_p3, %p58_p0  ;;  %p200_p7 = scmp.lt.s32.totalorder %s3421_s26, 3 }
  0x11   : > { %s3844_s7 = scalar_select %p3513_p4, 1, 0 }
  0x12   : > { %s3845_s8 = scalar_select %p3518_p6, 1, 0 }
  0x13   : > { %p3523_p8 = pnand %p2320_p5, %p200_p7  ;;  %s3423_s10 = smov [#allocation6]  }
  0x14   : > { %s212_s11 = sshll.u32 %s3423_s10, 4  ;;  %s3424_s13 = smov [#allocation8]   ;;  %s213_s11 = int_to_ptr.vmem [resolvable:$true] %s212_s11 }
  0x15   : > { %s3846_s9 = scalar_select %p3523_p8, 1, 0 }
  0x16   : > { %p3000_p9 = pneg %p3523_p8  ;;  %s225_s14 = sshll.u32 %s3424_s13, 4  ;;  %s226_s14 = int_to_ptr.vmem [resolvable:$true] %s225_s14 }
  0x17   : > { %s3425_s15 = smov [#allocation9]   ;;  %s3238_s17 = scalar_lea.vmem %s213_s11, 4096 }
  0x18   : > { %p3532_p11 = pnand %p3000_p9, %p3503_p1  ;;  %s241_s16 = sshll.u32 %s3425_s15, 4  ;;  %s242_s16 = int_to_ptr.vmem [resolvable:$true] %s241_s16 }
  0x19   : > { %p3239_p13 = scmp.ne.s32.totalorder %s213_s11, %s3238_s17  ;;  %p3246_p5 = scmp.lt.s32.totalorder %s213_s11, %s213_s11 }
  0x1a   : > { %p3229_p12 = pneg %p3532_p11  ;;  %p3247_p7 = scmp.lt.s32.totalorder %s3238_s17, %s3238_s17 }
  0x1c   : > { %p3241_p0 = pnand %p3239_p13, %p3229_p12  ;;  %p3248_p9 = por %p3247_p7, %p3246_p5 }
  0x1e   : > { %p3242_p3 = pneg %p3241_p0 }
  0x20   : > { %p3249_p10 = pnand %p3248_p9, %p3242_p3 }
  0x22   : > { %3252 = shalt.err (!%p3249_p10)
}
  0x23   : > { %s3426_s18 = smov 64   ;;  %s3427_s19 = smov 4  }
  0x24   : > { %s3848_s1 = sld [smem:[#allocation16_spill]]  ;;  %s3264_s28 = scalar_lea.vmem %s226_s14, 1024 }
  0x25   : > { %p3265_p6 = scmp.ne.s32.totalorder %s226_s14, %s3264_s28  ;;  %p3272_p1 = scmp.lt.s32.totalorder %s226_s14, %s226_s14 }
  0x26   : > { %p3273_p4 = scmp.lt.s32.totalorder %s3264_s28, %s3264_s28 }
  0x27   : > { %p3267_p13 = pnand %p3265_p6, %p3229_p12 }
  0x28   : > { %p3274_p5 = por %p3273_p4, %p3272_p1 }
  0x29   : > { %p3268_p0 = pneg %p3267_p13 }
  0x2a   : > { %3003 = dma.hbm_to_vmem [thread:$0]  (!%p3532_p11), %s3848_s1, 4096, %s213_s11, [#allocation7], %s3426_s18, %s3426_s18, %s3427_s19  }
  0x2b   : > { %p3275_p3 = pnand %p3274_p5, %p3268_p0 }
  0x2d   : > { %3278 = shalt.err (!%p3275_p3)
}
  0x2e   : > { %s3849_s2 = sld [smem:[#allocation17_spill]]  ;;  %s3290_s11 = scalar_lea.vmem %s242_s16, 1024 }
  0x2f   : > { %p3291_p10 = scmp.ne.s32.totalorder %s242_s16, %s3290_s11  ;;  %p3298_p9 = scmp.lt.s32.totalorder %s242_s16, %s242_s16 }
  0x30   : > { %p3299_p13 = scmp.lt.s32.totalorder %s3290_s11, %s3290_s11 }
  0x31   : > { %p3293_p7 = pnand %p3291_p10, %p3229_p12 }
  0x32   : > { %p3300_p8 = por %p3299_p13, %p3298_p9 }
  0x33   : > { %p3294_p6 = pneg %p3293_p7 }
  0x34   : > { %3006 = dma.hbm_to_vmem [thread:$0]  (!%p3532_p11), %s3849_s2, 1024, %s226_s14, [#allocation7], %s3426_s18, %s3426_s18, %s3427_s19  }
  0x35   : > { %p3301_p1 = pnand %p3300_p8, %p3294_p6 }
  0x37   : > { %3304 = shalt.err (!%p3301_p1)
}
  0x38   : > { %3009 = dma.hbm_to_vmem [thread:$0]  (!%p3532_p11), %s3833_s4, 1024, %s242_s16, [#allocation10], %s3426_s18, %s3426_s18, %s3427_s19  }
  0x39   : > { %s45_s14 = sadd.s32 1, %s3409_s23  ;;  %s36_s20 = sadd.s32 1, %s3417_s25 }
  0x3a   : > { %p52_p4 = scmp.ne.s32.totalorder %s3409_s23, %s3405_s22  ;;  %p38_p8 = scmp.ge.s32.totalorder %s36_s20, 2 }
  0x3b   : > { %p53_p12 = scmp.eq.s32.totalorder %s3421_s26, 0  ;;  %p3021_p5 = scmp.lt.s32.totalorder %s3421_s26, 2 }
  0x3c   : > { %p3569_p0 = por %p3507_p2, %p52_p4  ;;  %s3863_s20 = smov (%p38_p8, %s36_s20), 0 }
  0x3d   : > { %p54_p3 = por %p53_p12, %p52_p4  ;;  %s258_s27 = sand.u32 1, %s3409_s23  }
  0x3e   : > { %s40_s28 = ssub.s32 %s3417_s25, %s3863_s20  ;;  %s2325_s16 = sshll.u32 %s258_s27, 9 }
  0x3f   : > { %p43_p10 = scmp.eq.s32.totalorder %s40_s28, 0  ;;  %s2487_s18 = sshll.u32 %s3417_s25, 13 }
  0x40   : > { %s271_s30 = scalar_lea.hbm %s3829_s0, %s2487_s18  ;;  %s262_s11 = scalar_lea.vmem [#allocation3], %s2325_s16 }
  0x41   : > { %s3581_s19 = scalar_select %p43_p10, %s3409_s23, %s45_s14  }
  0x42   : > { %s272_s15 = sshll.u32 %s262_s11, 4  ;;  %p3588_p2 = pnand %p3021_p5, %p54_p3  ;;  %s273_s15 = int_to_ptr.vmem [resolvable:$true] %s272_s15 }
  0x43   : > { %s259_s1 = scalar_lea.sflag [#allocation4], %s258_s27  ;;  %s3318_s28 = scalar_lea.vmem %s273_s15, 8192 }
  0x44   : > { %p3307_p11 = pneg %p3588_p2  ;;  %p3319_p7 = scmp.ne.s32.totalorder %s273_s15, %s3318_s28 }
  0x45   : > { %s3428_s14 = smov [#allocation3]  }
  0x46   : > { %p3321_p6 = pnand %p3319_p7, %p3307_p11  ;;  %s3323_s2 = sshll.u32 %s3428_s14, 4  ;;  %s3324_s2 = int_to_ptr.vmem [resolvable:$false] %s3323_s2 }
  0x47   : > { %s3325_s18 = scalar_lea.vmem %s3324_s2, 16384  ;;  %p3326_p13 = scmp.lt.s32.totalorder %s273_s15, %s3324_s2 }
  0x48   : > { %p3322_p9 = pneg %p3321_p6  ;;  %p3327_p1 = scmp.lt.s32.totalorder %s3325_s18, %s3318_s28 }
  0x4a   : > { %p3328_p4 = por %p3327_p1, %p3326_p13 }
  0x4c   : > { %p3329_p8 = pnand %p3328_p4, %p3322_p9 }
  0x4e   : > { %3332 = shalt.err (!%p3329_p8)
}
  0x4f   : > { %s3429_s16 = smov 256   ;;  %s3430_s10 = smov 16  }
  0x50   : > { %3013 = dma.hbm_to_vmem [thread:$0]  (!%p3588_p2), %s271_s30, 8192, %s273_s15, %s259_s1, %s3429_s16, %s3429_s16, %s3430_s10  }
  0x51   : > { %p3852_p12 = scmp.ne.s32.totalorder %s3846_s9, 0 }
  0x52   : > { %s3599_s27 = sand.u32 (!%p3852_p12), 1, %s3405_s22   ;;  %p3853_p5 = scmp.ne.s32.totalorder (!%p3852_p12), %s3844_s7, 0 }
  0x53   : > { %284 = sbr.rel (%p3852_p12) target bundleno = 879 (0x36f), region = 44  ;;  %s2330_s13 = sshll.u32 (!%p3852_p12), %s3599_s27, 9 }
  0x54   : > { %s287_s2 = scalar_lea.sflag (!%p3852_p12), [#allocation4], %s3599_s27  ;;  %s3603_s11 = scalar_lea.vmem (!%p3852_p12), [#allocation3], %s2330_s13 }
  0x58   : > { %3384 = dma.done.wait (%p3853_p5), %s287_s2, 8192  }
  0x59   : > { %3386 = vsyncadd (%p3853_p5), %s287_s2, 4294959104  ;;  %p3854_p3 = scmp.ne.s32.totalorder %s3842_s29, 0 }
  0x5b   : > { %3388 = dma.done.wait (%p3854_p3), [#allocation7], 5120  }
  0x5c   : > { %3390 = vsyncadd (%p3854_p3), [#allocation7], 4294962176 }
  0x5d   : > { %3392 = dma.done.wait (%p3854_p3), [#allocation10], 1024  }
  0x5e   : > { %3394 = vsyncadd (%p3854_p3), [#allocation10], 4294966272  ;;  %v3083_v0 = vld [vmem:[#allocation6 + $0x78] sm:$0xff]   ;;  %v3087_v4 = vld [vmem:[#allocation6 + $0x70] sm:$0xff]   ;;  %s2334_s30 = sshll.u32 %s3599_s27, 7  ;;  %s2520_s17 = sshll.u32 %s3413_s24, 11 }
  0x5f   : > { %v3084_v1 = vld [vmem:[#allocation6 + $0xf8] sm:$0xff]   ;;  %2616 = vmatprep.subr.bf16.mxu0 %v3083_v0  ;;  %v3088_v5 = vld [vmem:[#allocation6 + $0xf0] sm:$0xff]   ;;  %v3091_v8 = vld [vmem:[#allocation6 + $0x68] sm:$0xff]   ;;  %s3728_s15 = scalar_lea.vmem [#allocation11], %s2334_s30  ;;  %s3777_s16 = scalar_lea.hbm %s3835_s6, %s2520_s17 }
  0x60   : > { %v3085_v2 = vld [vmem:[#allocation6 + $0x38] sm:$0xff]   ;;  %2728 = vmatprep.subr.bf16.mxu1 %v3084_v1  ;;  %v3089_v6 = vld [vmem:[#allocation6 + $0x30] sm:$0xff]   ;;  %v3092_v9 = vld [vmem:[#allocation6 + $0xe8] sm:$0xff]   ;;  %s2203_s28 = sshll.u32 %s3728_s15, 4  ;;  %s2190_s10 = scalar_lea.sflag [#allocation5], %s3599_s27  ;;  %s3779_s28 = int_to_ptr.vmem [resolvable:$true] %s2203_s28 }
  0x61   : > { %v3086_v3 = vld [vmem:[#allocation6 + $0xb8] sm:$0xff]   ;;  %2617 = vmatpush3.bf16.msra.mxu0 %v3085_v2  ;;  %v3090_v7 = vld [vmem:[#allocation6 + $0xb0] sm:$0xff]   ;;  %v3093_v10 = vld [vmem:[#allocation6 + $0x28] sm:$0xff]   ;;  %s3333_s13 = scalar_lea.vmem %s3779_s28, 2048  ;;  %s3431_s24 = smov [#allocation11]  }
  0x62   : > { %2729 = vmatpush3.bf16.msra.mxu1 %v3086_v3  ;;  %2618 = vmatprep.subr.bf16.mxu0 %v3087_v4  ;;  %v3094_v11 = vld [vmem:[#allocation6 + $0xa8] sm:$0xff]   ;;  %v3095_v12 = vld [vmem:[#allocation6 + $0x60] sm:$0xff]   ;;  %v3099_v16 = vld [vmem:[#allocation6 + $0x58] sm:$0xff]   ;;  %p3334_p10 = scmp.ne.s32.totalorder %s3779_s28, %s3333_s13  ;;  %s3337_s2 = sshll.u32 %s3431_s24, 4  ;;  %s3338_s2 = int_to_ptr.vmem [resolvable:$false] %s3337_s2 }
  0x63   : > { %2730 = vmatprep.subr.bf16.mxu1 %v3088_v5  ;;  %v3096_v13 = vld [vmem:[#allocation6 + $0xe0] sm:$0xff]   ;;  %v3100_v17 = vld [vmem:[#allocation6 + $0xd8] sm:$0xff]   ;;  %v3103_v20 = vld [vmem:[#allocation6 + $0x50] sm:$0xff]   ;;  %p3340_p7 = scmp.lt.s32.totalorder %s3779_s28, %s3338_s2 }
  0x64   : > { %v3097_v14 = vld [vmem:[#allocation6 + $0x20] sm:$0xff]   ;;  %v3101_v18 = vld [vmem:[#allocation6 + $0x18] sm:$0xff]   ;;  %v3104_v21 = vld [vmem:[#allocation6 + $0xd0] sm:$0xff]   ;;  %p3335_p2 = pnand %p3334_p10, %p3569_p0 }
  0x65   : > { %2619 = vmatpush3.bf16.msra.mxu0 %v3089_v6  ;;  %v3098_v15 = vld [vmem:[#allocation6 + $0xa0] sm:$0xff]   ;;  %v3102_v19 = vld [vmem:[#allocation6 + $0x98] sm:$0xff]   ;;  %v3105_v22 = vld [vmem:[#allocation6 + $0x10] sm:$0xff]  }
  0x66   : > { %2731 = vmatpush3.bf16.msra.mxu1 %v3090_v7  ;;  %2620 = vmatprep.subr.bf16.mxu0 %v3091_v8  ;;  %v3106_v23 = vld [vmem:[#allocation6 + $0x90] sm:$0xff]   ;;  %v3107_v24 = vld [vmem:[#allocation6 + $0x48] sm:$0xff]   ;;  %v3111_v28 = vld [vmem:[#allocation6 + $0x40] sm:$0xff]   ;;  %p3336_p11 = pneg %p3335_p2 }
  0x67   : > { %2732 = vmatprep.subr.bf16.mxu1 %v3092_v9  ;;  %v3108_v25 = vld [vmem:[#allocation6 + $0xc8] sm:$0xff]   ;;  %v3112_v29 = vld [vmem:[#allocation6 + $0xc0] sm:$0xff]   ;;  %v3211_v58 = vld [vmem:[#allocation8 + $0x38] sm:$0xff]  }
  0x68   : > { %v3109_v26 = vld [vmem:[#allocation6 + $0x8] sm:$0xff]   ;;  %v3113_v30 = vld [vmem:[#allocation6] sm:$0xff]   ;;  %v3212_v59 = vld [vmem:[#allocation8 + $0x30] sm:$0xff]  }
  0x69   : > { %2621 = vmatpush3.bf16.msra.mxu0 %v3093_v10  ;;  %v3110_v27 = vld [vmem:[#allocation6 + $0x88] sm:$0xff]   ;;  %v3114_v31 = vld [vmem:[#allocation6 + $0x80] sm:$0xff]  }
  0x6a   : > { %2733 = vmatpush3.bf16.msra.mxu1 %v3094_v11  ;;  %2622 = vmatprep.subr.bf16.mxu0 %v3095_v12  ;;  %v3115_v32 = vld [vmem:[%s3603_s11] ss:$16 sps:$4 sm:$0xff]   ;;  %v3117_v33 = vld [vmem:[%s3603_s11 + $0x4] ss:$16 sps:$4 sm:$0xff]   ;;  %v3118_v34 = vld [vmem:[%s3603_s11 + $0x8] ss:$16 sps:$4 sm:$0xff]  }
  0x6b   : > { %2734 = vmatprep.subr.bf16.mxu1 %v3096_v13  ;;  %v3120_v35 = vld [vmem:[%s3603_s11 + $0xc] ss:$16 sps:$4 sm:$0xff]   ;;  %1080 = vmatprep.mubr.bf16.mxu0 %v3117_v33  ;;  %v3121_v36 = vld [vmem:[%s3603_s11 + $0x24] ss:$16 sps:$4 sm:$0xff]   ;;  %v3125_v38 = vld [vmem:[%s3603_s11 + $0x20] ss:$16 sps:$4 sm:$0xff]  }
  0x6c   : > { %1241 = vmatprep.mubr.bf16.mxu1 %v3120_v35  ;;  %v3123_v37 = vld [vmem:[%s3603_s11 + $0x2c] ss:$16 sps:$4 sm:$0xff]   ;;  %v3126_v39 = vld [vmem:[%s3603_s11 + $0x28] ss:$16 sps:$4 sm:$0xff]   ;;  %v3127_v40 = vld [vmem:[%s3603_s11 + $0x44] ss:$16 sps:$4 sm:$0xff]  }
  0x6d   : > { %2623 = vmatpush3.bf16.msra.mxu0 %v3097_v14  ;;  %v3129_v41 = vld [vmem:[%s3603_s11 + $0x4c] ss:$16 sps:$4 sm:$0xff]   ;;  %v3131_v42 = vld [vmem:[%s3603_s11 + $0x40] ss:$16 sps:$4 sm:$0xff]   ;;  %v3132_v43 = vld [vmem:[%s3603_s11 + $0x48] ss:$16 sps:$4 sm:$0xff]  }
  0x6e   : > { %2735 = vmatpush3.bf16.msra.mxu1 %v3098_v15  ;;  %2624 = vmatprep.subr.bf16.mxu0 %v3099_v16  ;;  %v3133_v44 = vld [vmem:[%s3603_s11 + $0x64] ss:$16 sps:$4 sm:$0xff]   ;;  %v3135_v45 = vld [vmem:[%s3603_s11 + $0x6c] ss:$16 sps:$4 sm:$0xff]   ;;  %v3137_v46 = vld [vmem:[%s3603_s11 + $0x60] ss:$16 sps:$4 sm:$0xff]  }
  0x6f   : > { %2736 = vmatprep.subr.bf16.mxu1 %v3100_v17  ;;  %v3138_v47 = vld [vmem:[%s3603_s11 + $0x68] ss:$16 sps:$4 sm:$0xff]   ;;  %v3139_v48 = vld [vmem:[%s3603_s11 + $0x84] ss:$16 sps:$4 sm:$0xff]   ;;  %v3141_v49 = vld [vmem:[%s3603_s11 + $0x8c] ss:$16 sps:$4 sm:$0xff]  }
  0x70   : > { %v3143_v50 = vld [vmem:[%s3603_s11 + $0x80] ss:$16 sps:$4 sm:$0xff]   ;;  %v3144_v51 = vld [vmem:[%s3603_s11 + $0x88] ss:$16 sps:$4 sm:$0xff]   ;;  %v3145_v52 = vld [vmem:[%s3603_s11 + $0xa4] ss:$16 sps:$4 sm:$0xff]  }
  0x71   : > { %2625 = vmatpush3.bf16.msra.mxu0 %v3101_v18  ;;  %v3147_v53 = vld [vmem:[%s3603_s11 + $0xac] ss:$16 sps:$4 sm:$0xff]   ;;  %v3149_v54 = vld [vmem:[%s3603_s11 + $0xa0] ss:$16 sps:$4 sm:$0xff]   ;;  %v3150_v55 = vld [vmem:[%s3603_s11 + $0xa8] ss:$16 sps:$4 sm:$0xff]  }
  0x72   : > { %2737 = vmatpush3.bf16.msra.mxu1 %v3102_v19  ;;  %2626 = vmatprep.subr.bf16.mxu0 %v3103_v20  ;;  %v3151_v56 = vld [vmem:[%s3603_s11 + $0xc4] ss:$16 sps:$4 sm:$0xff]   ;;  %v3153_v57 = vld [vmem:[%s3603_s11 + $0xcc] ss:$16 sps:$4 sm:$0xff]   ;;  %v3155_v60 = vld [vmem:[%s3603_s11 + $0xc0] ss:$16 sps:$4 sm:$0xff]  }
  0x73   : > { %2738 = vmatprep.subr.bf16.mxu1 %v3104_v21  ;;  %v3213_v61 = vld [vmem:[#allocation8 + $0x28] sm:$0xff]   ;;  %v3157_v63 = vld [vmem:[%s3603_s11 + $0xe4] ss:$16 sps:$4 sm:$0xff]   ;;  %v3161_v2 = vld [vmem:[%s3603_s11 + $0xe0] ss:$16 sps:$4 sm:$0xff]  }
  0x74   : > { %v3156_v62 = vld [vmem:[%s3603_s11 + $0xc8] ss:$16 sps:$4 sm:$0xff]   ;;  %v3159_v0 = vld [vmem:[%s3603_s11 + $0xec] ss:$16 sps:$4 sm:$0xff]   ;;  %v3214_v1 = vld [vmem:[#allocation8 + $0x20] sm:$0xff]  }
  0x75   : > { %2627 = vmatpush3.bf16.msra.mxu0 %v3105_v22  ;;  %v3162_v3 = vld [vmem:[%s3603_s11 + $0xe8] ss:$16 sps:$4 sm:$0xff]   ;;  %v3163_v4 = vld [vmem:[%s3603_s11 + $0x104] ss:$16 sps:$4 sm:$0xff]   ;;  %v3165_v5 = vld [vmem:[%s3603_s11 + $0x10c] ss:$16 sps:$4 sm:$0xff]  }
  0x76   : > { %2739 = vmatpush3.bf16.msra.mxu1 %v3106_v23  ;;  %2628 = vmatprep.subr.bf16.mxu0 %v3107_v24  ;;  %v3167_v6 = vld [vmem:[%s3603_s11 + $0x100] ss:$16 sps:$4 sm:$0xff]   ;;  %v3168_v7 = vld [vmem:[%s3603_s11 + $0x108] ss:$16 sps:$4 sm:$0xff]   ;;  %v3169_v8 = vld [vmem:[%s3603_s11 + $0x124] ss:$16 sps:$4 sm:$0xff]  }
  0x77   : > { %2740 = vmatprep.subr.bf16.mxu1 %v3108_v25  ;;  %v3171_v9 = vld [vmem:[%s3603_s11 + $0x12c] ss:$16 sps:$4 sm:$0xff]   ;;  %v3173_v10 = vld [vmem:[%s3603_s11 + $0x120] ss:$16 sps:$4 sm:$0xff]   ;;  %v3174_v12 = vld [vmem:[%s3603_s11 + $0x128] ss:$16 sps:$4 sm:$0xff]  }
  0x78   : > { %v3215_v11 = vld [vmem:[#allocation8 + $0x18] sm:$0xff]   ;;  %v3175_v13 = vld [vmem:[%s3603_s11 + $0x144] ss:$16 sps:$4 sm:$0xff]   ;;  %v3179_v16 = vld [vmem:[%s3603_s11 + $0x140] ss:$16 sps:$4 sm:$0xff]  }
  0x79   : > { %2629 = vmatpush3.bf16.msra.mxu0 %v3109_v26  ;;  %v3177_v14 = vld [vmem:[%s3603_s11 + $0x14c] ss:$16 sps:$4 sm:$0xff]   ;;  %v3216_v15 = vld [vmem:[#allocation8 + $0x10] sm:$0xff]   ;;  %v3180_v18 = vld [vmem:[%s3603_s11 + $0x148] ss:$16 sps:$4 sm:$0xff]  }
  0x7a   : > { %2741 = vmatpush3.bf16.msra.mxu1 %v3110_v27  ;;  %2630 = vmatprep.subr.bf16.mxu0 %v3111_v28  ;;  %v3217_v17 = vld [vmem:[#allocation8 + $0x8] sm:$0xff]   ;;  %v3181_v19 = vld [vmem:[%s3603_s11 + $0x164] ss:$16 sps:$4 sm:$0xff]   ;;  %v3185_v22 = vld [vmem:[%s3603_s11 + $0x160] ss:$16 sps:$4 sm:$0xff]  }
  0x7b   : > { %2742 = vmatprep.subr.bf16.mxu1 %v3112_v29  ;;  %v3183_v20 = vld [vmem:[%s3603_s11 + $0x16c] ss:$16 sps:$4 sm:$0xff]   ;;  %v3218_v21 = vld [vmem:[#allocation8] sm:$0xff]   ;;  %v3186_v23 = vld [vmem:[%s3603_s11 + $0x168] ss:$16 sps:$4 sm:$0xff]  }
  0x7c   : > { %v3187_v24 = vld [vmem:[%s3603_s11 + $0x184] ss:$16 sps:$4 sm:$0xff]   ;;  %v3189_v25 = vld [vmem:[%s3603_s11 + $0x18c] ss:$16 sps:$4 sm:$0xff]   ;;  %v3191_v26 = vld [vmem:[%s3603_s11 + $0x180] ss:$16 sps:$4 sm:$0xff]  }
  0x7d   : > { %2631 = vmatpush3.bf16.msra.mxu0 %v3113_v30  ;;  %v3192_v27 = vld [vmem:[%s3603_s11 + $0x188] ss:$16 sps:$4 sm:$0xff]   ;;  %v3193_v28 = vld [vmem:[%s3603_s11 + $0x1a4] ss:$16 sps:$4 sm:$0xff]   ;;  %v3195_v29 = vld [vmem:[%s3603_s11 + $0x1ac] ss:$16 sps:$4 sm:$0xff]  }
  0x7e   : > { %2743 = vmatpush3.bf16.msra.mxu1 %v3114_v31  ;;  %2888 = vmatprep.subr.bf16.mxu0 %v3211_v58  ;;  %v3197_v30 = vld [vmem:[%s3603_s11 + $0x1a0] ss:$16 sps:$4 sm:$0xff]   ;;  %v3198_v31 = vld [vmem:[%s3603_s11 + $0x1a8] ss:$16 sps:$4 sm:$0xff]   ;;  %v3201_v33 = vld [vmem:[%s3603_s11 + $0x1cc] ss:$16 sps:$4 sm:$0xff]  }
  0x7f   : > { %v3204_v35 = vld [vmem:[%s3603_s11 + $0x1c8] ss:$16 sps:$4 sm:$0xff]  }
  0x80   : > { %1081 = vmatmul.mubr.bf16.vlgmr.msra.gmra.mxu0 %v3115_v32  ;;  %v3199_v32 = vld [vmem:[%s3603_s11 + $0x1c4] ss:$16 sps:$4 sm:$0xff]  }
  0x81   : > { %1242 = vmatmul.mubr.bf16.vlgmr.msra.gmra.mxu1 %v3118_v34  ;;  %1088 = vmatprep.mubr.bf16.mxu0 %v3121_v36  ;;  %v3203_v34 = vld [vmem:[%s3603_s11 + $0x1c0] ss:$16 sps:$4 sm:$0xff]   ;;  %v3205_v36 = vld [vmem:[%s3603_s11 + $0x1e4] ss:$16 sps:$4 sm:$0xff]  }
  0x82   : > { %1249 = vmatprep.mubr.bf16.mxu1 %v3123_v37  ;;  %2889 = vmatpush3.bf16.msra.mxu0 %v3211_v58  ;;  %v3207_v37 = vld [vmem:[%s3603_s11 + $0x1ec] ss:$16 sps:$4 sm:$0xff]  }
  0x83   : > { %2890 = vmatprep.subr.bf16.mxu0 %v3212_v59 }
  0x86   : > { %2891 = vmatpush3.bf16.msra.mxu0 %v3212_v59  ;;  %v3221_v59 = vld [vmem:[#allocation9 + $0x28] sm:$0xff]  }
  0x87   : > { %2892 = vmatprep.subr.bf16.mxu0 %v3213_v61 }
  0x88   : > { %1089 = vmatmul.mubr.bf16.gmra.mxu0 %v3125_v38  ;;  %v3209_v38 = vld [vmem:[%s3603_s11 + $0x1e0] ss:$16 sps:$4 sm:$0xff]  }
  0x89   : > { %1250 = vmatmul.mubr.bf16.gmra.mxu1 %v3126_v39  ;;  %1096 = vmatprep.mubr.bf16.mxu0 %v3127_v40  ;;  %v3210_v39 = vld [vmem:[%s3603_s11 + $0x1e8] ss:$16 sps:$4 sm:$0xff]   ;;  %s3339_s11 = scalar_lea.vmem %s3338_s2, 4096 }
  0x8a   : > { %1257 = vmatprep.mubr.bf16.mxu1 %v3129_v41  ;;  %2893 = vmatpush3.bf16.msra.mxu0 %v3213_v61  ;;  %p3341_p6 = scmp.lt.s32.totalorder %s3339_s11, %s3333_s13 }
  0x8b   : > { %2894 = vmatprep.subr.bf16.mxu0 %v3214_v1 }
  0x8c   : > { %p3342_p9 = por %p3341_p6, %p3340_p7 }
  0x8e   : > { %2895 = vmatpush3.bf16.msra.mxu0 %v3214_v1  ;;  %p3343_p13 = pnand %p3342_p9, %p3336_p11 }
  0x8f   : > { %2896 = vmatprep.subr.bf16.mxu0 %v3215_v11 }
  0x90   : > { %1097 = vmatmul.mubr.bf16.gmra.mxu0 %v3131_v42 }
  0x91   : > { %1258 = vmatmul.mubr.bf16.gmra.mxu1 %v3132_v43  ;;  %1104 = vmatprep.mubr.bf16.mxu0 %v3133_v44 }
  0x92   : > { %1265 = vmatprep.mubr.bf16.mxu1 %v3135_v45  ;;  %2897 = vmatpush3.bf16.msra.mxu0 %v3215_v11 }
  0x93   : > { %2898 = vmatprep.subr.bf16.mxu0 %v3216_v15 }
  0x96   : > { %2899 = vmatpush3.bf16.msra.mxu0 %v3216_v15 }
  0x97   : > { %2900 = vmatprep.subr.bf16.mxu0 %v3217_v17 }
  0x98   : > { %1105 = vmatmul.mubr.bf16.gmra.mxu0 %v3137_v46 }
  0x99   : > { %1266 = vmatmul.mubr.bf16.gmra.mxu1 %v3138_v47  ;;  %1112 = vmatprep.mubr.bf16.mxu0 %v3139_v48 }
  0x9a   : > { %1273 = vmatprep.mubr.bf16.mxu1 %v3141_v49  ;;  %2901 = vmatpush3.bf16.msra.mxu0 %v3217_v17  ;;  %v3219_v49 = vld [vmem:[#allocation9 + $0x38] sm:$0xff]  }
  0x9b   : > { %2902 = vmatprep.subr.bf16.mxu0 %v3218_v21  ;;  %2936 = vmatprep.subr.bf16.mxu1 %v3219_v49 }
  0x9c   : > { %2937 = vmatpush3.bf16.msra.mxu1 %v3219_v49 }
  0x9e   : > { %2903 = vmatpush3.bf16.msra.mxu0 %v3218_v21 }
  0xa0   : > { %1113 = vmatmul.mubr.bf16.gmra.mxu0 %v3143_v50  ;;  %v3220_v50 = vld [vmem:[#allocation9 + $0x30] sm:$0xff]  }
  0xa1   : > { %1274 = vmatmul.mubr.bf16.gmra.mxu1 %v3144_v51  ;;  %1120 = vmatprep.mubr.bf16.mxu0 %v3145_v52 }
  0xa2   : > { %1281 = vmatprep.mubr.bf16.mxu1 %v3147_v53  ;;  %2938 = vmatprep.subr.bf16.mxu1 %v3220_v50 }
  0xa3   : > { %2939 = vmatpush3.bf16.msra.mxu1 %v3220_v50 }
  0xa4   : > { %2940 = vmatprep.subr.bf16.mxu1 %v3221_v59 }
  0xa7   : > { %2941 = vmatpush3.bf16.msra.mxu1 %v3221_v59 }
  0xa8   : > { %1121 = vmatmul.mubr.bf16.gmra.mxu0 %v3149_v54 }
  0xa9   : > { %1282 = vmatmul.mubr.bf16.gmra.mxu1 %v3150_v55  ;;  %1128 = vmatprep.mubr.bf16.mxu0 %v3151_v56 }
  0xaa   : > { %1289 = vmatprep.mubr.bf16.mxu1 %v3153_v57 }
  0xb0   : > { %1129 = vmatmul.mubr.bf16.gmra.mxu0 %v3155_v60 }
  0xb1   : > { %1290 = vmatmul.mubr.bf16.gmra.mxu1 %v3156_v62  ;;  %1136 = vmatprep.mubr.bf16.mxu0 %v3157_v63 }
  0xb2   : > { %1297 = vmatprep.mubr.bf16.mxu1 %v3159_v0 }
  0xb8   : > { %1137 = vmatmul.mubr.bf16.gmra.mxu0 %v3161_v2 }
  0xb9   : > { %1298 = vmatmul.mubr.bf16.gmra.mxu1 %v3162_v3  ;;  %1144 = vmatprep.mubr.bf16.mxu0 %v3163_v4  ;;  %v3222_v3 = vld [vmem:[#allocation9 + $0x20] sm:$0xff]  }
  0xba   : > { %1305 = vmatprep.mubr.bf16.mxu1 %v3165_v5  ;;  %2942 = vmatprep.subr.bf16.mxu1 %v3222_v3 }
  0xbb   : > { %2943 = vmatpush3.bf16.msra.mxu1 %v3222_v3 }
  0xc0   : > { %1145 = vmatmul.mubr.bf16.gmra.mxu0 %v3167_v6 }
  0xc1   : > { %1306 = vmatmul.mubr.bf16.gmra.mxu1 %v3168_v7  ;;  %1152 = vmatprep.mubr.bf16.mxu0 %v3169_v8 }
  0xc2   : > { %1313 = vmatprep.mubr.bf16.mxu1 %v3171_v9 }
  0xc8   : > { %1153 = vmatmul.mubr.bf16.gmra.mxu0 %v3173_v10 }
  0xc9   : > { %1314 = vmatmul.mubr.bf16.gmra.mxu1 %v3174_v12  ;;  %1160 = vmatprep.mubr.bf16.mxu0 %v3175_v13  ;;  %v3223_v12 = vld [vmem:[#allocation9 + $0x18] sm:$0xff]  }
  0xca   : > { %1321 = vmatprep.mubr.bf16.mxu1 %v3177_v14  ;;  %2944 = vmatprep.subr.bf16.mxu1 %v3223_v12 }
  0xcb   : > { %2945 = vmatpush3.bf16.msra.mxu1 %v3223_v12 }
  0xd0   : > { %1161 = vmatmul.mubr.bf16.gmra.mxu0 %v3179_v16 }
  0xd1   : > { %1322 = vmatmul.mubr.bf16.gmra.mxu1 %v3180_v18  ;;  %1168 = vmatprep.mubr.bf16.mxu0 %v3181_v19 }
  0xd2   : > { %1329 = vmatprep.mubr.bf16.mxu1 %v3183_v20 }
  0xd8   : > { %1169 = vmatmul.mubr.bf16.gmra.mxu0 %v3185_v22 }
  0xd9   : > { %1330 = vmatmul.mubr.bf16.gmra.mxu1 %v3186_v23  ;;  %1176 = vmatprep.mubr.bf16.mxu0 %v3187_v24 }
  0xda   : > { %1337 = vmatprep.mubr.bf16.mxu1 %v3189_v25 }
  0xe0   : > { %1177 = vmatmul.mubr.bf16.gmra.mxu0 %v3191_v26 }
  0xe1   : > { %1338 = vmatmul.mubr.bf16.gmra.mxu1 %v3192_v27  ;;  %1184 = vmatprep.mubr.bf16.mxu0 %v3193_v28 }
  0xe2   : > { %1345 = vmatprep.mubr.bf16.mxu1 %v3195_v29 }
  0xe8   : > { %1185 = vmatmul.mubr.bf16.gmra.mxu0 %v3197_v30 }
  0xe9   : > { %1346 = vmatmul.mubr.bf16.gmra.mxu1 %v3198_v31  ;;  %1192 = vmatprep.mubr.bf16.mxu0 %v3199_v32 }
  0xea   : > { %1353 = vmatprep.mubr.bf16.mxu1 %v3201_v33 }
  0xf0   : > { %1193 = vmatmul.mubr.bf16.gmra.mxu0 %v3203_v34 }
  0xf1   : > { %1354 = vmatmul.mubr.bf16.gmra.mxu1 %v3204_v35  ;;  %1200 = vmatprep.mubr.bf16.mxu0 %v3205_v36 }
  0xf2   : > { %1361 = vmatprep.mubr.bf16.mxu1 %v3207_v37 }
  0xf8   : > { %1201 = vmatmul.mubr.bf16.gmra.mxu0 %v3209_v38 }
  0xf9   : > { %1362 = vmatmul.mubr.bf16.gmra.mxu1 %v3210_v39 }
 0x140   : > { %v2632_v40 = vpop.f32.mrf.mxu0 }
 0x141   : > { %v2744_v41 = vpop.f32.mrf.mxu1 }
 0x142   : > { %v2633_v42 = vpop.f32.mrf.mxu0 }
 0x143   : > { %v2745_v43 = vpop.f32.mrf.mxu1  ;;  %v2634_v46 = vadd.f32 %v2633_v42, %v2632_v40 }
 0x144   : > { %v2635_v44 = vpop.f32.mrf.mxu0  ;;  %v2746_v47 = vadd.f32 %v2745_v43, %v2744_v41 }
 0x145   : > { %v2747_v45 = vpop.f32.mrf.mxu1 }
 0x146   : > { %v2636_v48 = vpop.f32.mrf.mxu0  ;;  %v1244_v56 = vadd.f32 %v2746_v47, %v2634_v46 }
 0x147   : > { %v2637_v51 = vadd.f32 %v2636_v48, %v2635_v44  ;;  %v2748_v52 = vpop.f32.mrf.mxu1 }
 0x148   : > { %v2749_v53 = vadd.f32 %v2748_v52, %v2747_v45  ;;  %v2638_v54 = vpop.f32.mrf.mxu0 }
 0x149   : > { %v2750_v55 = vpop.f32.mrf.mxu1 }
 0x14a   : > { %v1247_v57 = vadd.f32 %v2749_v53, %v2637_v51  ;;  %v2639_v58 = vpop.f32.mrf.mxu0 }
 0x14b   : > { %v2751_v60 = vpop.f32.mrf.mxu1  ;;  %v2640_v0 = vadd.f32 %v2639_v58, %v2638_v54 }
 0x14c   : > { %v2641_v61 = vpop.f32.mrf.mxu0  ;;  %v1469_v62 = vpack.c.bf16 %v1247_v57, %v1244_v56  ;;  %v2752_v1 = vadd.f32 %v2751_v60, %v2750_v55 }
 0x14d   : > { %v2753_v63 = vpop.f32.mrf.mxu1 }
 0x14e   : > { %2904 = vmatprep.mubr.bf16.mxu0 %v1469_v62  ;;  %v2642_v2 = vpop.f32.mrf.mxu0  ;;  %v1252_v9 = vadd.f32 %v2752_v1, %v2640_v0 }
 0x14f   : > { %v2643_v4 = vadd.f32 %v2642_v2, %v2641_v61  ;;  %v2754_v5 = vpop.f32.mrf.mxu1 }
 0x150   : > { %v2755_v6 = vadd.f32 %v2754_v5, %v2753_v63  ;;  %v2644_v7 = vpop.f32.mrf.mxu0 }
 0x151   : > { %v2756_v8 = vpop.f32.mrf.mxu1 }
 0x152   : > { %v1255_v10 = vadd.f32 %v2755_v6, %v2643_v4  ;;  %v2645_v11 = vpop.f32.mrf.mxu0 }
 0x153   : > { %v2757_v13 = vpop.f32.mrf.mxu1  ;;  %v2646_v17 = vadd.f32 %v2645_v11, %v2644_v7 }
 0x154   : > { %v1470_v14 = vpack.c.bf16 %v1255_v10, %v1252_v9  ;;  %v2647_v15 = vpop.f32.mrf.mxu0  ;;  %v2758_v18 = vadd.f32 %v2757_v13, %v2756_v8 }
 0x155   : > { %v2759_v16 = vpop.f32.mrf.mxu1 }
 0x156   : > { %2905 = vmatmul.mubr.bf16.vlgmr.msra.gmra.mxu0 %v1470_v14  ;;  %v2648_v19 = vpop.f32.mrf.mxu0  ;;  %v1260_v25 = vadd.f32 %v2758_v18, %v2646_v17 }
 0x157   : > { %v2649_v20 = vadd.f32 %v2648_v19, %v2647_v15  ;;  %v2760_v21 = vpop.f32.mrf.mxu1 }
 0x158   : > { %v2761_v22 = vadd.f32 %v2760_v21, %v2759_v16  ;;  %v2650_v23 = vpop.f32.mrf.mxu0 }
 0x159   : > { %v2762_v24 = vpop.f32.mrf.mxu1 }
 0x15a   : > { %v1263_v26 = vadd.f32 %v2761_v22, %v2649_v20  ;;  %v2651_v27 = vpop.f32.mrf.mxu0 }
 0x15b   : > { %v2763_v28 = vpop.f32.mrf.mxu1  ;;  %v2652_v32 = vadd.f32 %v2651_v27, %v2650_v23 }
 0x15c   : > { %v2653_v29 = vpop.f32.mrf.mxu0  ;;  %v1471_v30 = vpack.c.bf16 %v1263_v26, %v1260_v25  ;;  %v2764_v33 = vadd.f32 %v2763_v28, %v2762_v24 }
 0x15d   : > { %v2765_v31 = vpop.f32.mrf.mxu1 }
 0x15e   : > { %2908 = vmatprep.mubr.bf16.mxu0 %v1471_v30  ;;  %v2654_v34 = vpop.f32.mrf.mxu0  ;;  %v1268_v40 = vadd.f32 %v2764_v33, %v2652_v32 }
 0x15f   : > { %v2655_v35 = vadd.f32 %v2654_v34, %v2653_v29  ;;  %v2766_v36 = vpop.f32.mrf.mxu1 }
 0x160   : > { %v2767_v37 = vadd.f32 %v2766_v36, %v2765_v31  ;;  %v2656_v38 = vpop.f32.mrf.mxu0 }
 0x161   : > { %v2768_v39 = vpop.f32.mrf.mxu1 }
 0x162   : > { %v1271_v41 = vadd.f32 %v2767_v37, %v2655_v35  ;;  %v2657_v42 = vpop.f32.mrf.mxu0 }
 0x163   : > { %v2769_v43 = vpop.f32.mrf.mxu1  ;;  %v2658_v47 = vadd.f32 %v2657_v42, %v2656_v38 }
 0x164   : > { %v2659_v44 = vpop.f32.mrf.mxu0  ;;  %v1472_v45 = vpack.c.bf16 %v1271_v41, %v1268_v40  ;;  %v2770_v48 = vadd.f32 %v2769_v43, %v2768_v39 }
 0x165   : > { %v2771_v46 = vpop.f32.mrf.mxu1 }
 0x166   : > { %2909 = vmatmul.mubr.bf16.gmra.mxu0 %v1472_v45  ;;  %v2660_v49 = vpop.f32.mrf.mxu0  ;;  %v1276_v55 = vadd.f32 %v2770_v48, %v2658_v47 }
 0x167   : > { %v2661_v50 = vadd.f32 %v2660_v49, %v2659_v44  ;;  %v2772_v51 = vpop.f32.mrf.mxu1 }
 0x168   : > { %v2773_v52 = vadd.f32 %v2772_v51, %v2771_v46  ;;  %v2662_v53 = vpop.f32.mrf.mxu0 }
 0x169   : > { %v2774_v54 = vpop.f32.mrf.mxu1 }
 0x16a   : > { %v1279_v56 = vadd.f32 %v2773_v52, %v2661_v50  ;;  %v2663_v57 = vpop.f32.mrf.mxu0 }
 0x16b   : > { %v2775_v58 = vpop.f32.mrf.mxu1  ;;  %v2664_v62 = vadd.f32 %v2663_v57, %v2662_v53 }
 0x16c   : > { %v2665_v59 = vpop.f32.mrf.mxu0  ;;  %v1473_v60 = vpack.c.bf16 %v1279_v56, %v1276_v55  ;;  %v2776_v63 = vadd.f32 %v2775_v58, %v2774_v54 }
 0x16d   : > { %v2777_v61 = vpop.f32.mrf.mxu1 }
 0x16e   : > { %2912 = vmatprep.mubr.bf16.mxu0 %v1473_v60  ;;  %v2666_v0 = vpop.f32.mrf.mxu0  ;;  %v1284_v6 = vadd.f32 %v2776_v63, %v2664_v62 }
 0x16f   : > { %v2667_v1 = vadd.f32 %v2666_v0, %v2665_v59  ;;  %v2778_v2 = vpop.f32.mrf.mxu1 }
 0x170   : > { %v2779_v3 = vadd.f32 %v2778_v2, %v2777_v61  ;;  %v2668_v4 = vpop.f32.mrf.mxu0 }
 0x171   : > { %v2780_v5 = vpop.f32.mrf.mxu1 }
 0x172   : > { %v1287_v7 = vadd.f32 %v2779_v3, %v2667_v1  ;;  %v2669_v8 = vpop.f32.mrf.mxu0 }
 0x173   : > { %v2781_v9 = vpop.f32.mrf.mxu1  ;;  %v2670_v13 = vadd.f32 %v2669_v8, %v2668_v4 }
 0x174   : > { %v2671_v10 = vpop.f32.mrf.mxu0  ;;  %v1474_v11 = vpack.c.bf16 %v1287_v7, %v1284_v6  ;;  %v2782_v14 = vadd.f32 %v2781_v9, %v2780_v5 }
 0x175   : > { %v2783_v12 = vpop.f32.mrf.mxu1 }
 0x176   : > { %2913 = vmatmul.mubr.bf16.gmra.mxu0 %v1474_v11  ;;  %v2672_v15 = vpop.f32.mrf.mxu0  ;;  %v1292_v21 = vadd.f32 %v2782_v14, %v2670_v13 }
 0x177   : > { %v2673_v16 = vadd.f32 %v2672_v15, %v2671_v10  ;;  %v2784_v17 = vpop.f32.mrf.mxu1 }
 0x178   : > { %v2785_v18 = vadd.f32 %v2784_v17, %v2783_v12  ;;  %v2674_v19 = vpop.f32.mrf.mxu0  ;;  %v3224_v12 = vld [vmem:[#allocation9 + $0x10] sm:$0xff]  }
 0x179   : > { %v2786_v20 = vpop.f32.mrf.mxu1  ;;  %2946 = vmatprep.subr.bf16.mxu1 %v3224_v12 }
 0x17a   : > { %v1295_v22 = vadd.f32 %v2785_v18, %v2673_v16  ;;  %v2675_v23 = vpop.f32.mrf.mxu0  ;;  %2947 = vmatpush3.bf16.msra.mxu1 %v3224_v12 }
 0x17b   : > { %v2787_v24 = vpop.f32.mrf.mxu1  ;;  %v2676_v28 = vadd.f32 %v2675_v23, %v2674_v19 }
 0x17c   : > { %v2677_v25 = vpop.f32.mrf.mxu0  ;;  %v1475_v26 = vpack.c.bf16 %v1295_v22, %v1292_v21  ;;  %v2788_v29 = vadd.f32 %v2787_v24, %v2786_v20  ;;  %v3225_v21 = vld [vmem:[#allocation9 + $0x8] sm:$0xff]  }
 0x17d   : > { %v2789_v27 = vpop.f32.mrf.mxu1  ;;  %2948 = vmatprep.subr.bf16.mxu1 %v3225_v21 }
 0x17e   : > { %2916 = vmatprep.mubr.bf16.mxu0 %v1475_v26  ;;  %v2678_v30 = vpop.f32.mrf.mxu0  ;;  %v1300_v36 = vadd.f32 %v2788_v29, %v2676_v28  ;;  %2949 = vmatpush3.bf16.msra.mxu1 %v3225_v21  ;;  %v3226_v29 = vld [vmem:[#allocation9] sm:$0xff]  }
 0x17f   : > { %v2679_v31 = vadd.f32 %v2678_v30, %v2677_v25  ;;  %v2790_v32 = vpop.f32.mrf.mxu1  ;;  %2950 = vmatprep.subr.bf16.mxu1 %v3226_v29 }
 0x180   : > { %v2791_v33 = vadd.f32 %v2790_v32, %v2789_v27  ;;  %v2680_v34 = vpop.f32.mrf.mxu0 }
 0x181   : > { %v2792_v35 = vpop.f32.mrf.mxu1 }
 0x182   : > { %v1303_v37 = vadd.f32 %v2791_v33, %v2679_v31  ;;  %v2681_v38 = vpop.f32.mrf.mxu0  ;;  %2951 = vmatpush3.bf16.msra.mxu1 %v3226_v29 }
 0x183   : > { %v2793_v39 = vpop.f32.mrf.mxu1  ;;  %v2682_v43 = vadd.f32 %v2681_v38, %v2680_v34 }
 0x184   : > { %v2683_v40 = vpop.f32.mrf.mxu0  ;;  %v1476_v41 = vpack.c.bf16 %v1303_v37, %v1300_v36  ;;  %v2794_v44 = vadd.f32 %v2793_v39, %v2792_v35 }
 0x185   : > { %v2795_v42 = vpop.f32.mrf.mxu1 }
 0x186   : > { %2917 = vmatmul.mubr.bf16.gmra.mxu0 %v1476_v41  ;;  %v2684_v45 = vpop.f32.mrf.mxu0  ;;  %v1308_v51 = vadd.f32 %v2794_v44, %v2682_v43 }
 0x187   : > { %v2685_v46 = vadd.f32 %v2684_v45, %v2683_v40  ;;  %v2796_v47 = vpop.f32.mrf.mxu1 }
 0x188   : > { %v2797_v48 = vadd.f32 %v2796_v47, %v2795_v42  ;;  %v2686_v49 = vpop.f32.mrf.mxu0 }
 0x189   : > { %v2798_v50 = vpop.f32.mrf.mxu1 }
 0x18a   : > { %v1311_v52 = vadd.f32 %v2797_v48, %v2685_v46  ;;  %v2687_v53 = vpop.f32.mrf.mxu0 }
 0x18b   : > { %v2799_v54 = vpop.f32.mrf.mxu1  ;;  %v2688_v58 = vadd.f32 %v2687_v53, %v2686_v49 }
 0x18c   : > { %v2689_v55 = vpop.f32.mrf.mxu0  ;;  %v1477_v56 = vpack.c.bf16 %v1311_v52, %v1308_v51  ;;  %v2800_v59 = vadd.f32 %v2799_v54, %v2798_v50 }
 0x18d   : > { %v2801_v57 = vpop.f32.mrf.mxu1 }
 0x18e   : > { %2920 = vmatprep.mubr.bf16.mxu0 %v1477_v56  ;;  %v2690_v60 = vpop.f32.mrf.mxu0  ;;  %v1316_v2 = vadd.f32 %v2800_v59, %v2688_v58 }
 0x18f   : > { %v2691_v61 = vadd.f32 %v2690_v60, %v2689_v55  ;;  %v2802_v62 = vpop.f32.mrf.mxu1 }
 0x190   : > { %v2803_v63 = vadd.f32 %v2802_v62, %v2801_v57  ;;  %v2692_v0 = vpop.f32.mrf.mxu0 }
 0x191   : > { %v2804_v1 = vpop.f32.mrf.mxu1 }
 0x192   : > { %v1319_v3 = vadd.f32 %v2803_v63, %v2691_v61  ;;  %v2693_v4 = vpop.f32.mrf.mxu0 }
 0x193   : > { %v2805_v5 = vpop.f32.mrf.mxu1  ;;  %v2694_v9 = vadd.f32 %v2693_v4, %v2692_v0 }
 0x194   : > { %v2695_v6 = vpop.f32.mrf.mxu0  ;;  %v1478_v7 = vpack.c.bf16 %v1319_v3, %v1316_v2  ;;  %v2806_v10 = vadd.f32 %v2805_v5, %v2804_v1 }
 0x195   : > { %v2807_v8 = vpop.f32.mrf.mxu1 }
 0x196   : > { %2921 = vmatmul.mubr.bf16.gmra.mxu0 %v1478_v7  ;;  %v2696_v11 = vpop.f32.mrf.mxu0  ;;  %v1324_v18 = vadd.f32 %v2806_v10, %v2694_v9 }
 0x197   : > { %v2697_v13 = vadd.f32 %v2696_v11, %v2695_v6  ;;  %v2808_v14 = vpop.f32.mrf.mxu1 }
 0x198   : > { %v2809_v15 = vadd.f32 %v2808_v14, %v2807_v8  ;;  %v2698_v16 = vpop.f32.mrf.mxu0 }
 0x199   : > { %v2810_v17 = vpop.f32.mrf.mxu1 }
 0x19a   : > { %v1327_v19 = vadd.f32 %v2809_v15, %v2697_v13  ;;  %v2699_v20 = vpop.f32.mrf.mxu0 }
 0x19b   : > { %v2811_v22 = vpop.f32.mrf.mxu1  ;;  %v2700_v26 = vadd.f32 %v2699_v20, %v2698_v16 }
 0x19c   : > { %v2701_v23 = vpop.f32.mrf.mxu0  ;;  %v1479_v24 = vpack.c.bf16 %v1327_v19, %v1324_v18  ;;  %v2812_v27 = vadd.f32 %v2811_v22, %v2810_v17 }
 0x19d   : > { %v2813_v25 = vpop.f32.mrf.mxu1 }
 0x19e   : > { %2924 = vmatprep.mubr.bf16.mxu0 %v1479_v24  ;;  %v2702_v28 = vpop.f32.mrf.mxu0  ;;  %v1332_v35 = vadd.f32 %v2812_v27, %v2700_v26 }
 0x19f   : > { %v2703_v30 = vadd.f32 %v2702_v28, %v2701_v23  ;;  %v2814_v31 = vpop.f32.mrf.mxu1 }
 0x1a0   : > { %v2815_v32 = vadd.f32 %v2814_v31, %v2813_v25  ;;  %v2704_v33 = vpop.f32.mrf.mxu0 }
 0x1a1   : > { %v2816_v34 = vpop.f32.mrf.mxu1 }
 0x1a2   : > { %v1335_v36 = vadd.f32 %v2815_v32, %v2703_v30  ;;  %v2705_v37 = vpop.f32.mrf.mxu0 }
 0x1a3   : > { %v2817_v38 = vpop.f32.mrf.mxu1  ;;  %v2706_v42 = vadd.f32 %v2705_v37, %v2704_v33 }
 0x1a4   : > { %v2707_v39 = vpop.f32.mrf.mxu0  ;;  %v1480_v40 = vpack.c.bf16 %v1335_v36, %v1332_v35  ;;  %v2818_v43 = vadd.f32 %v2817_v38, %v2816_v34  ;;  %v3684_v34 = vld [vmem:[%s3832_s3] ss:$0 sm:$0xff] }
 0x1a5   : > { %v2819_v41 = vpop.f32.mrf.mxu1 }
 0x1a6   : > { %2925 = vmatmul.mubr.bf16.gmra.mxu0 %v1480_v40  ;;  %v2708_v44 = vpop.f32.mrf.mxu0  ;;  %v1340_v50 = vadd.f32 %v2818_v43, %v2706_v42 }
 0x1a7   : > { %v2709_v45 = vadd.f32 %v2708_v44, %v2707_v39  ;;  %v2820_v46 = vpop.f32.mrf.mxu1 }
 0x1a8   : > { %v2821_v47 = vadd.f32 %v2820_v46, %v2819_v41  ;;  %v2710_v48 = vpop.f32.mrf.mxu0 }
 0x1a9   : > { %v2822_v49 = vpop.f32.mrf.mxu1 }
 0x1aa   : > { %v1343_v51 = vadd.f32 %v2821_v47, %v2709_v45  ;;  %v2711_v52 = vpop.f32.mrf.mxu0 }
 0x1ab   : > { %v2823_v53 = vpop.f32.mrf.mxu1  ;;  %v2712_v57 = vadd.f32 %v2711_v52, %v2710_v48 }
 0x1ac   : > { %v2713_v54 = vpop.f32.mrf.mxu0  ;;  %v1481_v55 = vpack.c.bf16 %v1343_v51, %v1340_v50  ;;  %v2824_v58 = vadd.f32 %v2823_v53, %v2822_v49 }
 0x1ad   : > { %v2825_v56 = vpop.f32.mrf.mxu1 }
 0x1ae   : > { %2928 = vmatprep.mubr.bf16.mxu0 %v1481_v55  ;;  %v2714_v59 = vpop.f32.mrf.mxu0  ;;  %v1348_v1 = vadd.f32 %v2824_v58, %v2712_v57 }
 0x1af   : > { %v2715_v60 = vadd.f32 %v2714_v59, %v2713_v54  ;;  %v2826_v61 = vpop.f32.mrf.mxu1 }
 0x1b0   : > { %v2827_v62 = vadd.f32 %v2826_v61, %v2825_v56  ;;  %v2716_v63 = vpop.f32.mrf.mxu0 }
 0x1b1   : > { %v2828_v0 = vpop.f32.mrf.mxu1 }
 0x1b2   : > { %v1351_v2 = vadd.f32 %v2827_v62, %v2715_v60  ;;  %v2717_v3 = vpop.f32.mrf.mxu0 }
 0x1b3   : > { %v2829_v4 = vpop.f32.mrf.mxu1  ;;  %v2718_v8 = vadd.f32 %v2717_v3, %v2716_v63 }
 0x1b4   : > { %v2719_v5 = vpop.f32.mrf.mxu0  ;;  %v1482_v6 = vpack.c.bf16 %v1351_v2, %v1348_v1  ;;  %v2830_v9 = vadd.f32 %v2829_v4, %v2828_v0 }
 0x1b5   : > { %v2831_v7 = vpop.f32.mrf.mxu1 }
 0x1b6   : > { %2929 = vmatmul.mubr.bf16.gmra.mxu0 %v1482_v6  ;;  %v2720_v10 = vpop.f32.mrf.mxu0  ;;  %v1356_v16 = vadd.f32 %v2830_v9, %v2718_v8 }
 0x1b7   : > { %v2721_v11 = vadd.f32 %v2720_v10, %v2719_v5  ;;  %v2832_v12 = vpop.f32.mrf.mxu1 }
 0x1b8   : > { %v2833_v13 = vadd.f32 %v2832_v12, %v2831_v7  ;;  %v2722_v14 = vpop.f32.mrf.mxu0 }
 0x1b9   : > { %v2834_v15 = vpop.f32.mrf.mxu1 }
 0x1ba   : > { %v1359_v17 = vadd.f32 %v2833_v13, %v2721_v11  ;;  %v2723_v18 = vpop.f32.mrf.mxu0 }
 0x1bb   : > { %v2835_v19 = vpop.f32.mrf.mxu1  ;;  %v2724_v23 = vadd.f32 %v2723_v18, %v2722_v14 }
 0x1bc   : > { %v2725_v20 = vpop.f32.mrf.mxu0  ;;  %v1483_v21 = vpack.c.bf16 %v1359_v17, %v1356_v16  ;;  %v2836_v24 = vadd.f32 %v2835_v19, %v2834_v15 }
 0x1bd   : > { %v2837_v22 = vpop.f32.mrf.mxu1 }
 0x1be   : > { %2932 = vmatprep.mubr.bf16.mxu0 %v1483_v21  ;;  %v2726_v25 = vpop.f32.mrf.mxu0  ;;  %v1364_v29 = vadd.f32 %v2836_v24, %v2724_v23 }
 0x1bf   : > { %v2727_v26 = vadd.f32 %v2726_v25, %v2725_v20  ;;  %v2838_v27 = vpop.f32.mrf.mxu1 }
 0x1c0   : > { %v2839_v28 = vadd.f32 %v2838_v27, %v2837_v22 }
 0x1c2   : > { %v1367_v30 = vadd.f32 %v2839_v28, %v2727_v26 }
 0x1c4   : > { %v1484_v31 = vpack.c.bf16 %v1367_v30, %v1364_v29 }
 0x1c6   : > { %2933 = vmatmul.mubr.bf16.gmra.mxu0 %v1484_v31 }
 0x216   : > { %v2906_v32 = vpop.f32.mrf.mxu0 }
 0x217   : > { %v1599_v38 = vadd.f32 %v2906_v32, %v3684_v34 }
 0x218   : > { %v1590_v33 = vpop.f32.mrf.mxu0 }
 0x219   : > { %v1591_v36 = vadd.f32 %v3684_v34, %v1590_v33  ;;  %v1719_v44 = vmax.f32 %v1599_v38, 0.0 }
 0x21a   : > { %v2907_v35 = vpop.f32.mrf.mxu0 }
 0x21b   : > { %v1602_v37 = vadd.f32 %v2907_v35, %v3684_v34  ;;  %v1717_v42 = vmax.f32 %v1591_v36, 0.0 }
 0x21c   : > { %v1593_v39 = vpop.f32.mrf.mxu0 }
 0x21d   : > { %v1594_v40 = vadd.f32 %v3684_v34, %v1593_v39  ;;  %v1720_v41 = vmax.f32 %v1602_v37, 0.0 }
 0x21f   : > { %v1718_v43 = vmax.f32 %v1594_v40, 0.0  ;;  %v1750_v46 = vpack.c.bf16 %v1720_v41, %v1719_v44 }
 0x221   : > { %v1749_v45 = vpack.c.bf16 %v1718_v43, %v1717_v42 }
 0x223   : > { %2952 = vmatprep.mubr.bf16.mxu1 %v1749_v45 }
 0x224   : > { %2953 = vmatmul.mubr.bf16.vlgmr.msra.gmra.mxu1 %v1750_v46 }
 0x226   : > { %v2910_v47 = vpop.f32.mrf.mxu0 }
 0x227   : > { %v1615_v52 = vadd.f32 %v2910_v47, %v3684_v34 }
 0x228   : > { %v1606_v48 = vpop.f32.mrf.mxu0 }
 0x229   : > { %v1607_v50 = vadd.f32 %v3684_v34, %v1606_v48  ;;  %v1723_v58 = vmax.f32 %v1615_v52, 0.0 }
 0x22a   : > { %v2911_v49 = vpop.f32.mrf.mxu0 }
 0x22b   : > { %v1618_v51 = vadd.f32 %v2911_v49, %v3684_v34  ;;  %v1721_v56 = vmax.f32 %v1607_v50, 0.0 }
 0x22c   : > { %v1609_v53 = vpop.f32.mrf.mxu0 }
 0x22d   : > { %v1610_v54 = vadd.f32 %v3684_v34, %v1609_v53  ;;  %v1724_v55 = vmax.f32 %v1618_v51, 0.0 }
 0x22f   : > { %v1722_v57 = vmax.f32 %v1610_v54, 0.0  ;;  %v1752_v60 = vpack.c.bf16 %v1724_v55, %v1723_v58 }
 0x231   : > { %v1751_v59 = vpack.c.bf16 %v1722_v57, %v1721_v56 }
 0x233   : > { %2956 = vmatprep.mubr.bf16.mxu1 %v1751_v59 }
 0x234   : > { %2957 = vmatmul.mubr.bf16.gmra.mxu1 %v1752_v60 }
 0x236   : > { %v2914_v61 = vpop.f32.mrf.mxu0 }
 0x237   : > { %v1631_v2 = vadd.f32 %v2914_v61, %v3684_v34 }
 0x238   : > { %v1622_v62 = vpop.f32.mrf.mxu0 }
 0x239   : > { %v1623_v0 = vadd.f32 %v3684_v34, %v1622_v62  ;;  %v1727_v8 = vmax.f32 %v1631_v2, 0.0 }
 0x23a   : > { %v2915_v63 = vpop.f32.mrf.mxu0 }
 0x23b   : > { %v1634_v1 = vadd.f32 %v2915_v63, %v3684_v34  ;;  %v1725_v6 = vmax.f32 %v1623_v0, 0.0 }
 0x23c   : > { %v1625_v3 = vpop.f32.mrf.mxu0 }
 0x23d   : > { %v1626_v4 = vadd.f32 %v3684_v34, %v1625_v3  ;;  %v1728_v5 = vmax.f32 %v1634_v1, 0.0 }
 0x23f   : > { %v1726_v7 = vmax.f32 %v1626_v4, 0.0  ;;  %v1754_v10 = vpack.c.bf16 %v1728_v5, %v1727_v8 }
 0x241   : > { %v1753_v9 = vpack.c.bf16 %v1726_v7, %v1725_v6 }
 0x243   : > { %2960 = vmatprep.mubr.bf16.mxu1 %v1753_v9 }
 0x244   : > { %2961 = vmatmul.mubr.bf16.gmra.mxu1 %v1754_v10 }
 0x246   : > { %v2918_v11 = vpop.f32.mrf.mxu0 }
 0x247   : > { %v1647_v16 = vadd.f32 %v2918_v11, %v3684_v34 }
 0x248   : > { %v1638_v12 = vpop.f32.mrf.mxu0 }
 0x249   : > { %v1639_v14 = vadd.f32 %v3684_v34, %v1638_v12  ;;  %v1731_v22 = vmax.f32 %v1647_v16, 0.0 }
 0x24a   : > { %v2919_v13 = vpop.f32.mrf.mxu0 }
 0x24b   : > { %v1650_v15 = vadd.f32 %v2919_v13, %v3684_v34  ;;  %v1729_v20 = vmax.f32 %v1639_v14, 0.0 }
 0x24c   : > { %v1641_v17 = vpop.f32.mrf.mxu0 }
 0x24d   : > { %v1642_v18 = vadd.f32 %v3684_v34, %v1641_v17  ;;  %v1732_v19 = vmax.f32 %v1650_v15, 0.0 }
 0x24f   : > { %v1730_v21 = vmax.f32 %v1642_v18, 0.0  ;;  %v1756_v24 = vpack.c.bf16 %v1732_v19, %v1731_v22  ;;  %v3721_v19 = vld [vmem:[%s3834_s5] ss:$0 sm:$0xff] }
 0x251   : > { %v1755_v23 = vpack.c.bf16 %v1730_v21, %v1729_v20 }
 0x253   : > { %2964 = vmatprep.mubr.bf16.mxu1 %v1755_v23 }
 0x254   : > { %2965 = vmatmul.mubr.bf16.gmra.mxu1 %v1756_v24 }
 0x256   : > { %v2922_v25 = vpop.f32.mrf.mxu0 }
 0x257   : > { %v1663_v30 = vadd.f32 %v2922_v25, %v3684_v34 }
 0x258   : > { %v1654_v26 = vpop.f32.mrf.mxu0 }
 0x259   : > { %v1655_v28 = vadd.f32 %v3684_v34, %v1654_v26  ;;  %v1735_v37 = vmax.f32 %v1663_v30, 0.0 }
 0x25a   : > { %v2923_v27 = vpop.f32.mrf.mxu0 }
 0x25b   : > { %v1666_v29 = vadd.f32 %v2923_v27, %v3684_v34  ;;  %v1733_v35 = vmax.f32 %v1655_v28, 0.0 }
 0x25c   : > { %v1657_v31 = vpop.f32.mrf.mxu0 }
 0x25d   : > { %v1658_v32 = vadd.f32 %v3684_v34, %v1657_v31  ;;  %v1736_v33 = vmax.f32 %v1666_v29, 0.0 }
 0x25f   : > { %v1734_v36 = vmax.f32 %v1658_v32, 0.0  ;;  %v1758_v39 = vpack.c.bf16 %v1736_v33, %v1735_v37 }
 0x261   : > { %v1757_v38 = vpack.c.bf16 %v1734_v36, %v1733_v35 }
 0x263   : > { %2968 = vmatprep.mubr.bf16.mxu1 %v1757_v38 }
 0x264   : > { %2969 = vmatmul.mubr.bf16.gmra.mxu1 %v1758_v39 }
 0x266   : > { %v2926_v40 = vpop.f32.mrf.mxu0 }
 0x267   : > { %v1679_v45 = vadd.f32 %v2926_v40, %v3684_v34 }
 0x268   : > { %v1670_v41 = vpop.f32.mrf.mxu0 }
 0x269   : > { %v1671_v43 = vadd.f32 %v3684_v34, %v1670_v41  ;;  %v1739_v51 = vmax.f32 %v1679_v45, 0.0 }
 0x26a   : > { %v2927_v42 = vpop.f32.mrf.mxu0 }
 0x26b   : > { %v1682_v44 = vadd.f32 %v2927_v42, %v3684_v34  ;;  %v1737_v49 = vmax.f32 %v1671_v43, 0.0 }
 0x26c   : > { %v1673_v46 = vpop.f32.mrf.mxu0 }
 0x26d   : > { %v1674_v47 = vadd.f32 %v3684_v34, %v1673_v46  ;;  %v1740_v48 = vmax.f32 %v1682_v44, 0.0 }
 0x26f   : > { %v1738_v50 = vmax.f32 %v1674_v47, 0.0  ;;  %v1760_v53 = vpack.c.bf16 %v1740_v48, %v1739_v51 }
 0x271   : > { %v1759_v52 = vpack.c.bf16 %v1738_v50, %v1737_v49 }
 0x273   : > { %2972 = vmatprep.mubr.bf16.mxu1 %v1759_v52 }
 0x274   : > { %2973 = vmatmul.mubr.bf16.gmra.mxu1 %v1760_v53 }
 0x276   : > { %v2930_v54 = vpop.f32.mrf.mxu0 }
 0x277   : > { %v1695_v59 = vadd.f32 %v2930_v54, %v3684_v34 }
 0x278   : > { %v1686_v55 = vpop.f32.mrf.mxu0 }
 0x279   : > { %v1687_v57 = vadd.f32 %v3684_v34, %v1686_v55  ;;  %v1743_v1 = vmax.f32 %v1695_v59, 0.0 }
 0x27a   : > { %v2931_v56 = vpop.f32.mrf.mxu0 }
 0x27b   : > { %v1698_v58 = vadd.f32 %v2931_v56, %v3684_v34  ;;  %v1741_v63 = vmax.f32 %v1687_v57, 0.0 }
 0x27c   : > { %v1689_v60 = vpop.f32.mrf.mxu0 }
 0x27d   : > { %v1690_v61 = vadd.f32 %v3684_v34, %v1689_v60  ;;  %v1744_v62 = vmax.f32 %v1698_v58, 0.0 }
 0x27f   : > { %v1742_v0 = vmax.f32 %v1690_v61, 0.0  ;;  %v1762_v3 = vpack.c.bf16 %v1744_v62, %v1743_v1 }
 0x281   : > { %v1761_v2 = vpack.c.bf16 %v1742_v0, %v1741_v63 }
 0x283   : > { %2976 = vmatprep.mubr.bf16.mxu1 %v1761_v2 }
 0x284   : > { %2977 = vmatmul.mubr.bf16.gmra.mxu1 %v1762_v3 }
 0x286   : > { %v2934_v4 = vpop.f32.mrf.mxu0 }
 0x287   : > { %v1711_v9 = vadd.f32 %v2934_v4, %v3684_v34 }
 0x288   : > { %v1702_v5 = vpop.f32.mrf.mxu0 }
 0x289   : > { %v1703_v7 = vadd.f32 %v3684_v34, %v1702_v5  ;;  %v1747_v15 = vmax.f32 %v1711_v9, 0.0 }
 0x28a   : > { %v2935_v6 = vpop.f32.mrf.mxu0 }
 0x28b   : > { %v1714_v8 = vadd.f32 %v2935_v6, %v3684_v34  ;;  %v1745_v13 = vmax.f32 %v1703_v7, 0.0 }
 0x28c   : > { %v1705_v10 = vpop.f32.mrf.mxu0 }
 0x28d   : > { %v1706_v11 = vadd.f32 %v3684_v34, %v1705_v10  ;;  %v1748_v12 = vmax.f32 %v1714_v8, 0.0 }
 0x28f   : > { %v1746_v14 = vmax.f32 %v1706_v11, 0.0  ;;  %v1764_v17 = vpack.c.bf16 %v1748_v12, %v1747_v15 }
 0x291   : > { %v1763_v16 = vpack.c.bf16 %v1746_v14, %v1745_v13 }
 0x293   : > { %2980 = vmatprep.mubr.bf16.mxu1 %v1763_v16 }
 0x294   : > { %2981 = vmatmul.mubr.bf16.gmra.mxu1 %v1764_v17 }
 0x2e4   : > { %v2954_v18 = vpop.f32.mrf.mxu1 }
 0x2e5   : > { %v1879_v21 = vadd.f32 %v2954_v18, %v3721_v19 }
 0x2e6   : > { %v1870_v20 = vpop.f32.mrf.mxu1 }
 0x2e7   : > { %v1871_v34 = vadd.f32 %v3721_v19, %v1870_v20  ;;  %v1999_v25 = vmax.f32 %v1879_v21, 0.0 }
 0x2e8   : > { %v2955_v22 = vpop.f32.mrf.mxu1 }
 0x2e9   : > { %v1882_v23 = vadd.f32 %v2955_v22, %v3721_v19  ;;  %v1997_v28 = vmax.f32 %v1871_v34, 0.0 }
 0x2ea   : > { %v1873_v24 = vpop.f32.mrf.mxu1 }
 0x2eb   : > { %v2000_v26 = vmax.f32 %v1882_v23, 0.0  ;;  %v1874_v27 = vadd.f32 %v3721_v19, %v1873_v24 }
 0x2ed   : > { %v2529_v29 = vpack.c.bf16 %v2000_v26, %v1999_v25  ;;  %v1998_v30 = vmax.f32 %v1874_v27, 0.0 }
 0x2ef   : > { %2601 = vst [vmem:[%s3728_s15 + $0x8] sm:$0xff] %v2529_v29   ;;  %v2524_v31 = vpack.c.bf16 %v1998_v30, %v1997_v28 }
 0x2f1   : > { %2525 = vst [vmem:[%s3728_s15] sm:$0xff] %v2524_v31  }
 0x2f4   : > { %v2958_v32 = vpop.f32.mrf.mxu1 }
 0x2f5   : > { %v1895_v35 = vadd.f32 %v2958_v32, %v3721_v19 }
 0x2f6   : > { %v1886_v33 = vpop.f32.mrf.mxu1 }
 0x2f7   : > { %v1887_v37 = vadd.f32 %v3721_v19, %v1886_v33  ;;  %v2003_v40 = vmax.f32 %v1895_v35, 0.0 }
 0x2f8   : > { %v2959_v36 = vpop.f32.mrf.mxu1 }
 0x2f9   : > { %v1898_v38 = vadd.f32 %v2959_v36, %v3721_v19  ;;  %v2001_v43 = vmax.f32 %v1887_v37, 0.0 }
 0x2fa   : > { %v1889_v39 = vpop.f32.mrf.mxu1 }
 0x2fb   : > { %v2004_v41 = vmax.f32 %v1898_v38, 0.0  ;;  %v1890_v42 = vadd.f32 %v3721_v19, %v1889_v39 }
 0x2fd   : > { %v2539_v44 = vpack.c.bf16 %v2004_v41, %v2003_v40  ;;  %v2002_v45 = vmax.f32 %v1890_v42, 0.0 }
 0x2ff   : > { %2603 = vst [vmem:[%s3728_s15 + $0x18] sm:$0xff] %v2539_v44   ;;  %v2534_v46 = vpack.c.bf16 %v2002_v45, %v2001_v43 }
 0x301   : > { %2602 = vst [vmem:[%s3728_s15 + $0x10] sm:$0xff] %v2534_v46  }
 0x304   : > { %v2962_v47 = vpop.f32.mrf.mxu1 }
 0x305   : > { %v1911_v49 = vadd.f32 %v2962_v47, %v3721_v19 }
 0x306   : > { %v1902_v48 = vpop.f32.mrf.mxu1 }
 0x307   : > { %v1903_v51 = vadd.f32 %v3721_v19, %v1902_v48  ;;  %v2007_v54 = vmax.f32 %v1911_v49, 0.0 }
 0x308   : > { %v2963_v50 = vpop.f32.mrf.mxu1 }
 0x309   : > { %v1914_v52 = vadd.f32 %v2963_v50, %v3721_v19  ;;  %v2005_v57 = vmax.f32 %v1903_v51, 0.0 }
 0x30a   : > { %v1905_v53 = vpop.f32.mrf.mxu1 }
 0x30b   : > { %v2008_v55 = vmax.f32 %v1914_v52, 0.0  ;;  %v1906_v56 = vadd.f32 %v3721_v19, %v1905_v53 }
 0x30d   : > { %v2549_v58 = vpack.c.bf16 %v2008_v55, %v2007_v54  ;;  %v2006_v59 = vmax.f32 %v1906_v56, 0.0 }
 0x30f   : > { %2605 = vst [vmem:[%s3728_s15 + $0x28] sm:$0xff] %v2549_v58   ;;  %v2544_v60 = vpack.c.bf16 %v2006_v59, %v2005_v57 }
 0x311   : > { %2604 = vst [vmem:[%s3728_s15 + $0x20] sm:$0xff] %v2544_v60  }
 0x314   : > { %v2966_v61 = vpop.f32.mrf.mxu1 }
 0x315   : > { %v1927_v63 = vadd.f32 %v2966_v61, %v3721_v19 }
 0x316   : > { %v1918_v62 = vpop.f32.mrf.mxu1 }
 0x317   : > { %v1919_v1 = vadd.f32 %v3721_v19, %v1918_v62  ;;  %v2011_v4 = vmax.f32 %v1927_v63, 0.0 }
 0x318   : > { %v2967_v0 = vpop.f32.mrf.mxu1 }
 0x319   : > { %v1930_v2 = vadd.f32 %v2967_v0, %v3721_v19  ;;  %v2009_v7 = vmax.f32 %v1919_v1, 0.0 }
 0x31a   : > { %v1921_v3 = vpop.f32.mrf.mxu1 }
 0x31b   : > { %v2012_v5 = vmax.f32 %v1930_v2, 0.0  ;;  %v1922_v6 = vadd.f32 %v3721_v19, %v1921_v3 }
 0x31d   : > { %v2559_v8 = vpack.c.bf16 %v2012_v5, %v2011_v4  ;;  %v2010_v9 = vmax.f32 %v1922_v6, 0.0 }
 0x31f   : > { %2607 = vst [vmem:[%s3728_s15 + $0x38] sm:$0xff] %v2559_v8   ;;  %v2554_v10 = vpack.c.bf16 %v2010_v9, %v2009_v7 }
 0x321   : > { %2606 = vst [vmem:[%s3728_s15 + $0x30] sm:$0xff] %v2554_v10  }
 0x324   : > { %v2970_v11 = vpop.f32.mrf.mxu1 }
 0x325   : > { %v1943_v13 = vadd.f32 %v2970_v11, %v3721_v19 }
 0x326   : > { %v1934_v12 = vpop.f32.mrf.mxu1 }
 0x327   : > { %v1935_v15 = vadd.f32 %v3721_v19, %v1934_v12  ;;  %v2015_v18 = vmax.f32 %v1943_v13, 0.0 }
 0x328   : > { %v2971_v14 = vpop.f32.mrf.mxu1 }
 0x329   : > { %v1946_v16 = vadd.f32 %v2971_v14, %v3721_v19  ;;  %v2013_v22 = vmax.f32 %v1935_v15, 0.0 }
 0x32a   : > { %v1937_v17 = vpop.f32.mrf.mxu1 }
 0x32b   : > { %v2016_v20 = vmax.f32 %v1946_v16, 0.0  ;;  %v1938_v21 = vadd.f32 %v3721_v19, %v1937_v17 }
 0x32d   : > { %v2569_v34 = vpack.c.bf16 %v2016_v20, %v2015_v18  ;;  %v2014_v23 = vmax.f32 %v1938_v21, 0.0 }
 0x32f   : > { %2609 = vst [vmem:[%s3728_s15 + $0x48] sm:$0xff] %v2569_v34   ;;  %v2564_v24 = vpack.c.bf16 %v2014_v23, %v2013_v22 }
 0x331   : > { %2608 = vst [vmem:[%s3728_s15 + $0x40] sm:$0xff] %v2564_v24  }
 0x334   : > { %v2974_v25 = vpop.f32.mrf.mxu1 }
 0x335   : > { %v1959_v27 = vadd.f32 %v2974_v25, %v3721_v19 }
 0x336   : > { %v1950_v26 = vpop.f32.mrf.mxu1 }
 0x337   : > { %v1951_v29 = vadd.f32 %v3721_v19, %v1950_v26  ;;  %v2019_v32 = vmax.f32 %v1959_v27, 0.0 }
 0x338   : > { %v2975_v28 = vpop.f32.mrf.mxu1 }
 0x339   : > { %v1962_v30 = vadd.f32 %v2975_v28, %v3721_v19  ;;  %v2017_v36 = vmax.f32 %v1951_v29, 0.0 }
 0x33a   : > { %v1953_v31 = vpop.f32.mrf.mxu1 }
 0x33b   : > { %v2020_v33 = vmax.f32 %v1962_v30, 0.0  ;;  %v1954_v35 = vadd.f32 %v3721_v19, %v1953_v31 }
 0x33d   : > { %v2579_v37 = vpack.c.bf16 %v2020_v33, %v2019_v32  ;;  %v2018_v38 = vmax.f32 %v1954_v35, 0.0 }
 0x33f   : > { %2611 = vst [vmem:[%s3728_s15 + $0x58] sm:$0xff] %v2579_v37   ;;  %v2574_v39 = vpack.c.bf16 %v2018_v38, %v2017_v36 }
 0x341   : > { %2610 = vst [vmem:[%s3728_s15 + $0x50] sm:$0xff] %v2574_v39  }
 0x344   : > { %v2978_v40 = vpop.f32.mrf.mxu1 }
 0x345   : > { %v1975_v42 = vadd.f32 %v2978_v40, %v3721_v19 }
 0x346   : > { %v1966_v41 = vpop.f32.mrf.mxu1 }
 0x347   : > { %v1967_v44 = vadd.f32 %v3721_v19, %v1966_v41  ;;  %v2023_v47 = vmax.f32 %v1975_v42, 0.0 }
 0x348   : > { %v2979_v43 = vpop.f32.mrf.mxu1 }
 0x349   : > { %v1978_v45 = vadd.f32 %v2979_v43, %v3721_v19  ;;  %v2021_v50 = vmax.f32 %v1967_v44, 0.0 }
 0x34a   : > { %v1969_v46 = vpop.f32.mrf.mxu1 }
 0x34b   : > { %v2024_v48 = vmax.f32 %v1978_v45, 0.0  ;;  %v1970_v49 = vadd.f32 %v3721_v19, %v1969_v46 }
 0x34d   : > { %v2589_v51 = vpack.c.bf16 %v2024_v48, %v2023_v47  ;;  %v2022_v52 = vmax.f32 %v1970_v49, 0.0 }
 0x34f   : > { %2613 = vst [vmem:[%s3728_s15 + $0x68] sm:$0xff] %v2589_v51   ;;  %v2584_v53 = vpack.c.bf16 %v2022_v52, %v2021_v50 }
 0x351   : > { %2612 = vst [vmem:[%s3728_s15 + $0x60] sm:$0xff] %v2584_v53  }
 0x354   : > { %v2982_v54 = vpop.f32.mrf.mxu1 }
 0x355   : > { %v1991_v56 = vadd.f32 %v2982_v54, %v3721_v19 }
 0x356   : > { %v1982_v55 = vpop.f32.mrf.mxu1 }
 0x357   : > { %v1983_v58 = vadd.f32 %v3721_v19, %v1982_v55  ;;  %v2027_v61 = vmax.f32 %v1991_v56, 0.0 }
 0x358   : > { %v2983_v57 = vpop.f32.mrf.mxu1 }
 0x359   : > { %v1994_v59 = vadd.f32 %v2983_v57, %v3721_v19  ;;  %v2025_v0 = vmax.f32 %v1983_v58, 0.0 }
 0x35a   : > { %v1985_v60 = vpop.f32.mrf.mxu1 }
 0x35b   : > { %v2028_v62 = vmax.f32 %v1994_v59, 0.0  ;;  %v1986_v63 = vadd.f32 %v3721_v19, %v1985_v60 }
 0x35d   : > { %v2599_v1 = vpack.c.bf16 %v2028_v62, %v2027_v61  ;;  %v2026_v2 = vmax.f32 %v1986_v63, 0.0 }
 0x35f   : > { %2615 = vst [vmem:[%s3728_s15 + $0x78] sm:$0xff] %v2599_v1   ;;  %v2594_v3 = vpack.c.bf16 %v2026_v2, %v2025_v0 }
 0x361   : > { %2614 = vst [vmem:[%s3728_s15 + $0x70] sm:$0xff] %v2594_v3  }
 0x362   : > { %3346 = shalt.err (!%p3343_p13)
}
 0x363   : > { %s3347_s1 = scalar_lea.hbm %s3777_s16, 2048  ;;  %s3351_s9 = scalar_lea.hbm %s3835_s6, 4096 }
 0x364   : > { %p3348_p1 = scmp.ne.s32.totalorder %s3777_s16, %s3347_s1  ;;  %p3352_p12 = scmp.lt.s32.totalorder %s3777_s16, %s3835_s6 }
 0x365   : > { %p3353_p5 = scmp.lt.s32.totalorder %s3351_s9, %s3347_s1 }
 0x366   : > { %p3349_p4 = pnand %p3348_p1, %p3569_p0 }
 0x367   : > { %p3354_p3 = por %p3353_p5, %p3352_p12 }
 0x368   : > { %p3350_p8 = pneg %p3349_p4 }
 0x36a   : > { %p3355_p10 = pnand %p3354_p3, %p3350_p8 }
 0x36c   : > { %3358 = shalt.err (!%p3355_p10)
}
 0x36d   : > { %s3432_s17 = smov 64   ;;  %s3433_s14 = smov 4  }
 0x36e   : > { %2998 = dma.vmem_to_hbm [thread:$0]  (%p3569_p0), %s3779_s28, 2048, %s3777_s16, %s2190_s10, %s3432_s17, %s3432_s17, %s3433_s14  }
 0x36f PF: > { %s2218_s18 = sand.u32 1, %s3401_s21   ;;  %p3855_p2 = scmp.ne.s32.totalorder %s3845_s8, 0 }
 0x370   : > { %p3856_p11 = scmp.ge.s32.totalorder %s3421_s26, 2  ;;  %s2219_s13 = scalar_lea.sflag [#allocation5], %s2218_s18 }
 0x372   : > { %p3015_p7 = pnand %p3856_p11, %p3855_p2 }
 0x374   : > { %p3016_p6 = pneg %p3015_p7 }
 0x376   : > { %3396 = dma.done.wait (%p3016_p6), %s2219_s13, 2048  }
 0x377   : > { %3398 = vsyncadd (%p3016_p6), %s2219_s13, 4294965248  ;;  %s24_s26 = sadd.s32 1, %s3421_s26   ;;  %s3857_s21 = smov %s3405_s22 }
 0x378   : > { %p21_p9 = scmp.ge.s32.totalorder %s24_s26, 4   ;;  %s3858_s22 = smov %s3409_s23 }
 0x379   : > { %s3859_s23 = smov %s3581_s19  ;;  %s3860_s24 = smov %s3417_s25 }
 0x37a   : > { %s3861_s25 = smov %s3863_s20  ;;  %23 = sbr.rel (!%p21_p9) target bundleno = 11 (0xb), region = 110 }
 0x37f   :  { %2224 = vsyncpa [#allocation4], 1 }
 0x380   :  { %2226 = vsyncpa [#allocation4 + $0x1], 1 }
 0x381   :  { %2227 = vsyncpa [#allocation7], 1 }
 0x382   :  { %2228 = vsyncpa [#allocation10], 1 }
 0x383   :  { %2229 = vsyncpa [#allocation5], 1 }
 0x384   :  { %2231 = vsyncpa [#allocation5 + $0x1], 1 }

</bundles_post_ra>
